<compile_context>
chip_gen: v7x
topology: tpu7x:2x2x1
jax: 0.10.0
libtpu: 0.0.40
codegen_flags: <defaults>
</compile_context>

<pallas_src>
import jax
import jax.numpy as jnp
from jax.experimental import pallas as pl
from jax.experimental.pallas import tpu as pltpu


NEG_SLOPE = 0.01   # F.leaky_relu default
_CHUNK = 128       # rows per inner-loop step (one MXU-friendly tile)


def _round_up(x, m):
    return (x + m - 1) // m * m


def _cdiv(a, b):
    return (a + b - 1) // b


def _leaky_relu(x):
    return jnp.where(x > 0, x, NEG_SLOPE * x)


def discriminator_kernel(x_ref,
                         w0_ref, b0_ref,
                         w1_ref, b1_ref,
                         w2_ref, b2_ref,
                         w3t_ref, b3_ref,
                         o_ref):
    """Fused 4-layer MLP on one (tb, 784) batch tile resident in VMEM.

    x_ref  : (tb, 784) in the caller's dtype (f32/bf16) -- cast per chunk
    w*_ref : bf16 weights; b0..b2 f32 row biases in VMEM; b3 scalar in SMEM
    o_ref  : (1, 1, tb) f32 -- batch on the lane axis (lane-dense stores)
    """
    n_chunks = x_ref.shape[0] // _CHUNK

    # Hoist weight loads / bias broadcasts out of the chunk loop: JAX does not
    # CSE broadcast_in_dim and the unrolled body would re-issue the vector
    # loads once per chunk otherwise.
    w0 = w0_ref[...]
    w1 = w1_ref[...]
    w2 = w2_ref[...]
    w3t = w3t_ref[...]
    b0 = jnp.broadcast_to(b0_ref[...], (_CHUNK, w0.shape[1]))
    b1 = jnp.broadcast_to(b1_ref[...], (_CHUNK, w1.shape[1]))
    b2 = jnp.broadcast_to(b2_ref[...], (_CHUNK, w2.shape[1]))
    b3 = b3_ref[0]

    def body(c, carry):
        r = pl.multiple_of(c * _CHUNK, _CHUNK)
        # x streams from HBM in its original dtype; cast the chunk to bf16
        # here (bf16 MXU operands, f32 accumulation).
        xc = x_ref[pl.ds(r, _CHUNK), :].astype(jnp.bfloat16)                 # (128, 784)

        h = jnp.dot(xc, w0, preferred_element_type=jnp.float32)              # (128, 128)
        h = _leaky_relu(h + b0).astype(jnp.bfloat16)                          # dropout = id (eval)

        h = jnp.dot(h, w1, preferred_element_type=jnp.float32)               # (128, 64)
        h = _leaky_relu(h + b1).astype(jnp.bfloat16)

        h = jnp.dot(h, w2, preferred_element_type=jnp.float32)               # (128, 32)
        h = _leaky_relu(h + b2).astype(jnp.bfloat16)

        # Final layer "transposed": (1, 32) contracted with (128, 32) over the
        # feature dim -> (1, 128) with the batch on lanes.
        out = jax.lax.dot_general(
            w3t, h,
            dimension_numbers=(((1,), (1,)), ((), ())),
            preferred_element_type=jnp.float32)                               # (1, 128)
        out = out + b3

        o_ref[0, :, pl.ds(r, _CHUNK)] = out.astype(o_ref.dtype)
        return carry

    # Bounded unroll: full for small tiles, 4 otherwise (the step is DMA-bound,
    # so deeper unroll only bloats the bundle stream / vreg pressure).
    unroll = n_chunks if n_chunks <= 8 else 4
    jax.lax.fori_loop(0, n_chunks, body, 0, unroll=unroll)


def _select_tile(rows, tb):
    """Batch tile: multiple of _CHUNK, <= chunk-padded batch, and grid >= 2
    for moderate batches so the parallel axis shards across v7x's 2 TCs."""
    tb = _round_up(max(tb, _CHUNK), _CHUNK)
    tb = min(tb, _round_up(rows, _CHUNK))
    if rows > 2 * _CHUNK:
        tb = min(tb, _round_up(_cdiv(rows, 2), _CHUNK))
    return tb


def discriminator_forward(x, params, *, tb=1024):
    """x: (B, 784) or (B, 1, 28, 28), f32 or bf16.  Returns (B, 1) float32.

    params: w0..w3 stored (in_features, out_features) in bf16, b0..b3 f32.
    tb=1024 keeps the f32 x double-buffer (~6.4 MB) inside even v5e's 16 MiB
    default scoped VMEM; set vmem_limit_bytes if you raise tb to 2048+.
    """
    B = x.shape[0]
    x = x.reshape(B, 28 * 28)            # mirrors X.view(B, 784); no cast / pad

    # Degenerate tiny-batch case only: guarantee at least one full 128-row
    # chunk so the batch block never exceeds the array extent.  Cost is
    # negligible and never triggers for real batches.
    rows = B
    if rows < _CHUNK:
        x = jnp.pad(x, ((0, _CHUNK - rows), (0, 0)))
        rows = _CHUNK

    tb = _select_tile(rows, tb)
    grid = _cdiv(rows, tb)               # boundary block (if any) is padded by Pallas

    w0, b0 = params["w0"], params["b0"]
    w1, b1 = params["w1"], params["b1"]
    w2, b2 = params["w2"], params["b2"]
    w3t = params["w3"].T.astype(jnp.bfloat16)           # (1, 32) transposed last layer
    b3 = params["b3"].reshape(-1).astype(jnp.float32)   # (1,) scalar -> SMEM

    def const2d(shape):
        # Whole weight/bias array, same block every grid step (Pallas skips the
        # re-DMA when the block index does not change).
        return pl.BlockSpec(shape, lambda i: (0, 0))

    grid_spec = pltpu.PrefetchScalarGridSpec(
        num_scalar_prefetch=0,
        grid=(grid,),
        in_specs=[
            pl.BlockSpec((tb, 784), lambda i: (i, 0)),          # x tile over batch
            const2d(w0.shape), const2d(b0.shape),
            const2d(w1.shape), const2d(b1.shape),
            const2d(w2.shape), const2d(b2.shape),
            const2d(w3t.shape),
            pl.BlockSpec(memory_space=pltpu.MemorySpace.SMEM),  # b3 scalar
        ],
        # Lane-dense output: (grid, 1, tb) with batch on the lane axis.
        out_specs=pl.BlockSpec((1, 1, tb), lambda i: (i, 0, 0)),
    )

    out = pl.pallas_call(
        discriminator_kernel,
        out_shape=jax.ShapeDtypeStruct((grid, 1, tb), jnp.float32),
        grid_spec=grid_spec,
        compiler_params=pltpu.CompilerParams(
            dimension_semantics=("parallel",)),
    )(x, w0, b0, w1, b1, w2, b2, w3t, b3)

    return out.reshape(grid * tb, 1)[:B]


def init_params(key):
    """PyTorch nn.Linear-style init (U(-1/sqrt(fan_in), +)); weights stored bf16."""
    sizes = [(784, 128), (128, 64), (64, 32), (32, 1)]
    params = {}
    for idx, (fan_in, fan_out) in enumerate(sizes):
        key, kw, kb = jax.random.split(key, 3)
        bound = 1.0 / jnp.sqrt(fan_in)
        w = jax.random.uniform(kw, (fan_in, fan_out), jnp.float32, -bound, bound)
        b = jax.random.uniform(kb, (1, fan_out), jnp.float32, -bound, bound)
        params[f"w{idx}"] = w.astype(jnp.bfloat16)
        params[f"b{idx}"] = b
    return params


def reference_forward(x, params):
    """Pure-JAX f32 reference using the same bf16-quantized weights / input."""
    h = x.reshape(x.shape[0], 28 * 28)
    h = h.astype(jnp.bfloat16).astype(jnp.float32)   # same input quantization as kernel
    for idx in range(3):
        w = params[f"w{idx}"].astype(jnp.float32)
        b = params[f"b{idx}"].astype(jnp.float32)
        h = h @ w + b
        h = jnp.where(h > 0, h, NEG_SLOPE * h)
    return h @ params["w3"].astype(jnp.float32) + params["b3"].astype(jnp.float32)


if __name__ == "__main__":
    key = jax.random.PRNGKey(0)
    kx, kx2, kp = jax.random.split(key, 3)
    params = init_params(kp)

    # Small batch, shaped like the PyTorch module's input (B, 1, 28, 28).
    B = 8
    x = jax.random.normal(kx, (B, 1, 28, 28), jnp.float32)
    out = jax.block_until_ready(discriminator_forward(x, params))
    ref = reference_forward(x, params)
    assert out.shape == (B, 1)
    assert jnp.allclose(out, ref, atol=2e-2, rtol=2e-2), "mismatch vs JAX reference (B=8)"

    # Second check: batch not a multiple of the tile -> exercises the padded
    # boundary block and grid=2 (megacore path).
    B2 = 384
    x2 = jax.random.normal(kx2, (B2, 1, 28, 28), jnp.float32)
    out2 = jax.block_until_ready(discriminator_forward(x2, params))
    ref2 = reference_forward(x2, params)
    assert out2.shape == (B2, 1)
    assert jnp.allclose(out2, ref2, atol=2e-2, rtol=2e-2), "mismatch vs JAX reference (B=384)"

    print("KERNEL_OK")
</pallas_src>

<mosaic_0001>
module attributes {stable_mosaic.version = 11 : i64} {
  func.func @discriminator_kernel(%arg0: i32, %arg1: memref<128x784xf32, #tpu.memory_space<vmem>>, %arg2: memref<784x128xbf16, #tpu.memory_space<vmem>>, %arg3: memref<1x128xf32, #tpu.memory_space<vmem>>, %arg4: memref<128x64xbf16, #tpu.memory_space<vmem>>, %arg5: memref<1x64xf32, #tpu.memory_space<vmem>>, %arg6: memref<64x32xbf16, #tpu.memory_space<vmem>>, %arg7: memref<1x32xf32, #tpu.memory_space<vmem>>, %arg8: memref<1x32xbf16, #tpu.memory_space<vmem>>, %arg9: memref<1xf32, #tpu.memory_space<smem>>, %arg10: memref<1x1x128xf32, #tpu.memory_space<vmem>>) attributes {dimension_semantics = [#tpu.dimension_semantics<parallel>], iteration_bounds = array<i64: 1>, scalar_prefetch = 0 : i64, scratch_operands = 0 : i64, tpu.core_type = #tpu.core_type<tc>, window_params = [{transform_indices = @transform_0, window_bounds = array<i64: 128, 784>}, {pipeline_mode = #tpu.pipeline_mode<synchronous>, transform_indices = @transform_1, window_bounds = array<i64: 784, 128>}, {pipeline_mode = #tpu.pipeline_mode<synchronous>, transform_indices = @transform_2, window_bounds = array<i64: 1, 128>}, {pipeline_mode = #tpu.pipeline_mode<synchronous>, transform_indices = @transform_3, window_bounds = array<i64: 128, 64>}, {pipeline_mode = #tpu.pipeline_mode<synchronous>, transform_indices = @transform_4, window_bounds = array<i64: 1, 64>}, {pipeline_mode = #tpu.pipeline_mode<synchronous>, transform_indices = @transform_5, window_bounds = array<i64: 64, 32>}, {pipeline_mode = #tpu.pipeline_mode<synchronous>, transform_indices = @transform_6, window_bounds = array<i64: 1, 32>}, {pipeline_mode = #tpu.pipeline_mode<synchronous>, transform_indices = @transform_7, window_bounds = array<i64: 1, 32>}, {transform_indices = @transform_8, window_bounds = array<i64: 1>}, {transform_indices = @transform_9, window_bounds = array<i64: 1, 1, 128>}]} {
    %c0 = arith.constant 0 : index
    %c0_0 = arith.constant 0 : index
    %0 = vector.load %arg2[%c0, %c0_0] : memref<784x128xbf16, #tpu.memory_space<vmem>>, vector<784x128xbf16>
    %c0_1 = arith.constant 0 : index
    %c0_2 = arith.constant 0 : index
    %1 = vector.load %arg4[%c0_1, %c0_2] : memref<128x64xbf16, #tpu.memory_space<vmem>>, vector<128x64xbf16>
    %c0_3 = arith.constant 0 : index
    %c0_4 = arith.constant 0 : index
    %2 = vector.load %arg6[%c0_3, %c0_4] : memref<64x32xbf16, #tpu.memory_space<vmem>>, vector<64x32xbf16>
    %c0_5 = arith.constant 0 : index
    %c0_6 = arith.constant 0 : index
    %3 = vector.load %arg8[%c0_5, %c0_6] : memref<1x32xbf16, #tpu.memory_space<vmem>>, vector<1x32xbf16>
    %c0_7 = arith.constant 0 : index
    %c0_8 = arith.constant 0 : index
    %4 = vector.load %arg3[%c0_7, %c0_8] : memref<1x128xf32, #tpu.memory_space<vmem>>, vector<1x128xf32>
    %5 = vector.shape_cast %4 : vector<1x128xf32> to vector<1x128xf32>
    %6 = vector.broadcast %5 : vector<1x128xf32> to vector<128x128xf32>
    %c0_9 = arith.constant 0 : index
    %c0_10 = arith.constant 0 : index
    %7 = vector.load %arg5[%c0_9, %c0_10] : memref<1x64xf32, #tpu.memory_space<vmem>>, vector<1x64xf32>
    %8 = vector.shape_cast %7 : vector<1x64xf32> to vector<1x64xf32>
    %9 = vector.broadcast %8 : vector<1x64xf32> to vector<128x64xf32>
    %c0_11 = arith.constant 0 : index
    %c0_12 = arith.constant 0 : index
    %10 = vector.load %arg7[%c0_11, %c0_12] : memref<1x32xf32, #tpu.memory_space<vmem>>, vector<1x32xf32>
    %11 = vector.shape_cast %10 : vector<1x32xf32> to vector<1x32xf32>
    %12 = vector.broadcast %11 : vector<1x32xf32> to vector<128x32xf32>
    %c0_13 = arith.constant 0 : index
    %13 = memref.load %arg9[%c0_13] : memref<1xf32, #tpu.memory_space<smem>>
    %c0_i32 = arith.constant 0 : i32
    %c128_i32 = arith.constant 128 : i32
    %14 = arith.muli %c0_i32, %c128_i32 : i32
    %15 = tpu.assume_multiple %14, 128 : i32
    %16 = arith.index_cast %15 : i32 to index
    %c0_14 = arith.constant 0 : index
    %17 = vector.load %arg1[%16, %c0_14] : memref<128x784xf32, #tpu.memory_space<vmem>>, vector<128x784xf32>
    %18 = arith.truncf %17 : vector<128x784xf32> to vector<128x784xbf16>
    %cst = arith.constant dense<0.000000e+00> : vector<128x128xf32>
    %19 = tpu.matmul %18, %0, %cst {dimension_numbers = #tpu.dot_dimension_numbers<[1], [0], [0], [1], [0, 0, 1, 1], [], []>} : vector<128x784xbf16>, vector<784x128xbf16>, vector<128x128xf32> -> vector<128x128xf32>
    %20 = arith.addf %19, %6 : vector<128x128xf32>
    %cst_15 = arith.constant 0.000000e+00 : f32
    %21 = vector.broadcast %cst_15 : f32 to vector<128x128xf32>
    %22 = arith.cmpf ogt, %20, %21 : vector<128x128xf32>
    %cst_16 = arith.constant 0.00999999977 : f32
    %23 = vector.broadcast %cst_16 : f32 to vector<128x128xf32>
    %24 = arith.mulf %23, %20 : vector<128x128xf32>
    %25 = arith.select %22, %20, %24 : vector<128x128xi1>, vector<128x128xf32>
    %26 = arith.truncf %25 : vector<128x128xf32> to vector<128x128xbf16>
    %cst_17 = arith.constant dense<0.000000e+00> : vector<128x64xf32>
    %27 = tpu.matmul %26, %1, %cst_17 {dimension_numbers = #tpu.dot_dimension_numbers<[1], [0], [0], [1], [0, 0, 1, 1], [], []>} : vector<128x128xbf16>, vector<128x64xbf16>, vector<128x64xf32> -> vector<128x64xf32>
    %28 = arith.addf %27, %9 : vector<128x64xf32>
    %cst_18 = arith.constant 0.000000e+00 : f32
    %29 = vector.broadcast %cst_18 : f32 to vector<128x64xf32>
    %30 = arith.cmpf ogt, %28, %29 : vector<128x64xf32>
    %cst_19 = arith.constant 0.00999999977 : f32
    %31 = vector.broadcast %cst_19 : f32 to vector<128x64xf32>
    %32 = arith.mulf %31, %28 : vector<128x64xf32>
    %33 = arith.select %30, %28, %32 : vector<128x64xi1>, vector<128x64xf32>
    %34 = arith.truncf %33 : vector<128x64xf32> to vector<128x64xbf16>
    %cst_20 = arith.constant dense<0.000000e+00> : vector<128x32xf32>
    %35 = tpu.matmul %34, %2, %cst_20 {dimension_numbers = #tpu.dot_dimension_numbers<[1], [0], [0], [1], [0, 0, 1, 1], [], []>} : vector<128x64xbf16>, vector<64x32xbf16>, vector<128x32xf32> -> vector<128x32xf32>
    %36 = arith.addf %35, %12 : vector<128x32xf32>
    %cst_21 = arith.constant 0.000000e+00 : f32
    %37 = vector.broadcast %cst_21 : f32 to vector<128x32xf32>
    %38 = arith.cmpf ogt, %36, %37 : vector<128x32xf32>
    %cst_22 = arith.constant 0.00999999977 : f32
    %39 = vector.broadcast %cst_22 : f32 to vector<128x32xf32>
    %40 = arith.mulf %39, %36 : vector<128x32xf32>
    %41 = arith.select %38, %36, %40 : vector<128x32xi1>, vector<128x32xf32>
    %42 = arith.truncf %41 : vector<128x32xf32> to vector<128x32xbf16>
    %cst_23 = arith.constant dense<0.000000e+00> : vector<1x128xf32>
    %43 = tpu.matmul %3, %42, %cst_23 {dimension_numbers = #tpu.dot_dimension_numbers<[1], [1], [0], [0], [0, 0, 1, 0], [], []>} : vector<1x32xbf16>, vector<128x32xbf16>, vector<1x128xf32> -> vector<1x128xf32>
    %44 = vector.broadcast %13 : f32 to vector<1x128xf32>
    %45 = arith.addf %43, %44 : vector<1x128xf32>
    %c0_24 = arith.constant 0 : index
    %c0_25 = arith.constant 0 : index
    %46 = arith.index_cast %15 : i32 to index
    %47 = vector.load %arg10[%c0_24, %c0_25, %46] : memref<1x1x128xf32, #tpu.memory_space<vmem>>, vector<1x1x128xf32>
    %48 = vector.shape_cast %47 : vector<1x1x128xf32> to vector<1x128xf32>
    %49 = vector.shape_cast %45 : vector<1x128xf32> to vector<1x1x128xf32>
    tpu.vector_store %arg10[%c0_24, %c0_25, %46], %49 {strides = array<i32>} : memref<1x1x128xf32, #tpu.memory_space<vmem>>, vector<1x1x128xf32>,
    %c1_i32 = arith.constant 1 : i32
    return
  }
  func.func @transform_0(%arg0: i32) -> (i32, i32) {
    %c0_i32 = arith.constant 0 : i32
    %c0_i32_0 = arith.constant 0 : i32
    return %arg0, %c0_i32 : i32, i32
  }
  func.func @transform_1(%arg0: i32) -> (i32, i32) {
    %c0_i32 = arith.constant 0 : i32
    %c0_i32_0 = arith.constant 0 : i32
    %c0_i32_1 = arith.constant 0 : i32
    return %c0_i32, %c0_i32_0 : i32, i32
  }
  func.func @transform_2(%arg0: i32) -> (i32, i32) {
    %c0_i32 = arith.constant 0 : i32
    %c0_i32_0 = arith.constant 0 : i32
    %c0_i32_1 = arith.constant 0 : i32
    return %c0_i32, %c0_i32_0 : i32, i32
  }
  func.func @transform_3(%arg0: i32) -> (i32, i32) {
    %c0_i32 = arith.constant 0 : i32
    %c0_i32_0 = arith.constant 0 : i32
    %c0_i32_1 = arith.constant 0 : i32
    return %c0_i32, %c0_i32_0 : i32, i32
  }
  func.func @transform_4(%arg0: i32) -> (i32, i32) {
    %c0_i32 = arith.constant 0 : i32
    %c0_i32_0 = arith.constant 0 : i32
    %c0_i32_1 = arith.constant 0 : i32
    return %c0_i32, %c0_i32_0 : i32, i32
  }
  func.func @transform_5(%arg0: i32) -> (i32, i32) {
    %c0_i32 = arith.constant 0 : i32
    %c0_i32_0 = arith.constant 0 : i32
    %c0_i32_1 = arith.constant 0 : i32
    return %c0_i32, %c0_i32_0 : i32, i32
  }
  func.func @transform_6(%arg0: i32) -> (i32, i32) {
    %c0_i32 = arith.constant 0 : i32
    %c0_i32_0 = arith.constant 0 : i32
    %c0_i32_1 = arith.constant 0 : i32
    return %c0_i32, %c0_i32_0 : i32, i32
  }
  func.func @transform_7(%arg0: i32) -> (i32, i32) {
    %c0_i32 = arith.constant 0 : i32
    %c0_i32_0 = arith.constant 0 : i32
    %c0_i32_1 = arith.constant 0 : i32
    return %c0_i32, %c0_i32_0 : i32, i32
  }
  func.func @transform_8(%arg0: i32) -> i32 {
    %c0_i32 = arith.constant 0 : i32
    %c0_i32_0 = arith.constant 0 : i32
    return %c0_i32 : i32
  }
  func.func @transform_9(%arg0: i32) -> (i32, i32, i32) {
    %c0_i32 = arith.constant 0 : i32
    %c0_i32_0 = arith.constant 0 : i32
    %c0_i32_1 = arith.constant 0 : i32
    return %arg0, %c0_i32, %c0_i32_0 : i32, i32, i32
  }
}

</mosaic_0001>

<bundles_post_ra>
// kernel: tpu_custom_call.1
= control target key start
LH: loop header
LB: loop body
LE: loop exit
PB: predicated region body
PF: predicated region fallthrough
CT: control target
= control target key end

     0   :  { %vm645_vm0 = vcmask 130048   ;;  %s2849_s0 = inlined_call_operand.vmem [shape: f32[128,784], index: 0, kind: input, shape index: {}]   ;;  %s2850_s1 = inlined_call_operand.vmem [shape: bf16[784,128], index: 1, kind: input, shape index: {}]   ;;  %s2851_s2 = inlined_call_operand.vmem [shape: f32[1,128], index: 2, kind: input, shape index: {}]   ;;  %s2852_s3 = inlined_call_operand.vmem [shape: bf16[128,64], index: 3, kind: input, shape index: {}]   ;;  %s2853_s4 = inlined_call_operand.vmem [shape: f32[1,64], index: 4, kind: input, shape index: {}]   ;;  %s2854_s5 = inlined_call_operand.vmem [shape: bf16[64,32], index: 5, kind: input, shape index: {}]   ;;  %s2855_s6 = inlined_call_operand.vmem [shape: f32[1,32], index: 6, kind: input, shape index: {}]   ;;  %s2856_s7 = inlined_call_operand.vmem [shape: bf16[1,32], index: 7, kind: input, shape index: {}]   ;;  %s2857_s8 = inlined_call_operand.<no memory space> [shape: f32[1], index: 8, kind: input, shape index: {}]   ;;  %s2858_s9 = inlined_call_operand.hbm [shape: f32[1,1,128], index: 9, kind: output, shape index: {}]  }
   0x1   :  { %v2017_v0 = vld [vmem:[%s2850_s1 + $0x40] sm:$0xff]   ;;  %v2021_v4 = vld [vmem:[%s2850_s1 + $0x48] sm:$0xff]   ;;  %v2025_v8 = vld [vmem:[%s2850_s1 + $0x50] sm:$0xff]  }
   0x2   :  { %v2018_v1 = vld [vmem:[%s2850_s1] sm:$0xff]   ;;  %1682 = vmatprep.subr.bf16.mxu0 %v2017_v0  ;;  %v2022_v5 = vld [vmem:[%s2850_s1 + $0x8] sm:$0xff]   ;;  %v2026_v9 = vld [vmem:[%s2850_s1 + $0x10] sm:$0xff]  }
   0x3   :  { %v2019_v2 = vld [vmem:[%s2850_s1 + $0xc0] sm:$0xff]   ;;  %1683 = vmatpush3.bf16.msra.mxu0 %v2018_v1  ;;  %v2023_v6 = vld [vmem:[%s2850_s1 + $0xc8] sm:$0xff]   ;;  %v2027_v10 = vld [vmem:[%s2850_s1 + $0xd0] sm:$0xff]  }
   0x4   :  { %v2020_v3 = vld [vmem:[%s2850_s1 + $0x80] sm:$0xff]   ;;  %1746 = vmatprep.subr.bf16.mxu1 %v2019_v2  ;;  %1684 = vmatprep.subr.bf16.mxu0 %v2021_v4  ;;  %v2024_v7 = vld [vmem:[%s2850_s1 + $0x88] sm:$0xff]   ;;  %v2028_v11 = vld [vmem:[%s2850_s1 + $0x90] sm:$0xff]  }
   0x5   :  { %1747 = vmatpush3.bf16.msra.mxu1 %v2020_v3  ;;  %v2029_v12 = vld [vmem:[%s2850_s1 + $0x58] sm:$0xff]   ;;  %v2033_v16 = vld [vmem:[%s2850_s1 + $0x60] sm:$0xff]   ;;  %v2037_v20 = vld [vmem:[%s2850_s1 + $0x68] sm:$0xff]  }
   0x6   :  { %1748 = vmatprep.subr.bf16.mxu1 %v2023_v6  ;;  %v2030_v13 = vld [vmem:[%s2850_s1 + $0x18] sm:$0xff]   ;;  %v2034_v17 = vld [vmem:[%s2850_s1 + $0x20] sm:$0xff]   ;;  %v2038_v21 = vld [vmem:[%s2850_s1 + $0x28] sm:$0xff]  }
   0x7   :  { %1685 = vmatpush3.bf16.msra.mxu0 %v2022_v5  ;;  %v2031_v14 = vld [vmem:[%s2850_s1 + $0xd8] sm:$0xff]   ;;  %v2035_v18 = vld [vmem:[%s2850_s1 + $0xe0] sm:$0xff]   ;;  %v2039_v22 = vld [vmem:[%s2850_s1 + $0xe8] sm:$0xff]  }
   0x8   :  { %1686 = vmatprep.subr.bf16.mxu0 %v2025_v8  ;;  %v2032_v15 = vld [vmem:[%s2850_s1 + $0x98] sm:$0xff]   ;;  %v2036_v19 = vld [vmem:[%s2850_s1 + $0xa0] sm:$0xff]   ;;  %v2040_v23 = vld [vmem:[%s2850_s1 + $0xa8] sm:$0xff]  }
   0x9   :  { %1749 = vmatpush3.bf16.msra.mxu1 %v2024_v7  ;;  %v2041_v24 = vld [vmem:[%s2850_s1 + $0x70] sm:$0xff]   ;;  %v2045_v28 = vld [vmem:[%s2850_s1 + $0x78] sm:$0xff]   ;;  %v184_v31 = vld [vmem:[%s2849_s0 + $0x8] sm:$0xff] }
   0xa   :  { %1750 = vmatprep.subr.bf16.mxu1 %v2027_v10  ;;  %v2042_v25 = vld [vmem:[%s2850_s1 + $0x30] sm:$0xff]   ;;  %v2046_v29 = vld [vmem:[%s2850_s1 + $0x38] sm:$0xff]   ;;  %v191_v32 = vld [vmem:[%s2849_s0 + $0x40] sm:$0xff] }
   0xb   :  { %1687 = vmatpush3.bf16.msra.mxu0 %v2026_v9  ;;  %v2043_v26 = vld [vmem:[%s2850_s1 + $0xf0] sm:$0xff]   ;;  %v2047_v30 = vld [vmem:[%s2850_s1 + $0xf8] sm:$0xff]   ;;  %v296_v33 = vpack.c.bf16 %v191_v32, %v184_v31  ;;  %v183_v35 = vld [vmem:[%s2849_s0] sm:$0xff] }
   0xc   :  { %1688 = vmatprep.subr.bf16.mxu0 %v2029_v12  ;;  %v2044_v27 = vld [vmem:[%s2850_s1 + $0xb0] sm:$0xff]   ;;  %v2048_v34 = vld [vmem:[%s2850_s1 + $0xb8] sm:$0xff]   ;;  %v2049_v38 = vld [vmem:[%s2850_s1 + $0x140] sm:$0xff]  }
   0xd   :  { %1751 = vmatpush3.bf16.msra.mxu1 %v2028_v11  ;;  %v190_v36 = vld [vmem:[%s2849_s0 + $0x38] sm:$0xff]  ;;  %702 = vmatprep.mubr.bf16.mxu0 %v296_v33  ;;  %v193_v40 = vld [vmem:[%s2849_s0 + $0x50] sm:$0xff]  ;;  %v2050_v42 = vld [vmem:[%s2850_s1 + $0x100] sm:$0xff]  }
   0xe   :  { %1752 = vmatprep.subr.bf16.mxu1 %v2031_v14  ;;  %v295_v37 = vpack.c.bf16 %v190_v36, %v183_v35  ;;  %v186_v39 = vld [vmem:[%s2849_s0 + $0x18] sm:$0xff]  ;;  %v185_v43 = vld [vmem:[%s2849_s0 + $0x10] sm:$0xff]  ;;  %v192_v44 = vld [vmem:[%s2849_s0 + $0x48] sm:$0xff] }
   0xf   :  { %1689 = vmatpush3.bf16.msra.mxu0 %v2030_v13  ;;  %v298_v41 = vpack.c.bf16 %v193_v40, %v186_v39  ;;  %v198_v45 = vld [vmem:[%s2849_s0 + $0x78] sm:$0xff]  ;;  %v297_v46 = vpack.c.bf16 %v192_v44, %v185_v43  ;;  %v205_v47 = vld [vmem:[%s2849_s0 + $0xb0] sm:$0xff]  ;;  %v204_v49 = vld [vmem:[%s2849_s0 + $0xa8] sm:$0xff] }
  0x10   :  { %1690 = vmatprep.subr.bf16.mxu0 %v2033_v16  ;;  %v197_v48 = vld [vmem:[%s2849_s0 + $0x70] sm:$0xff]  ;;  %v303_v50 = vpack.c.bf16 %v205_v47, %v198_v45  ;;  %v2051_v51 = vld [vmem:[%s2850_s1 + $0x148] sm:$0xff]   ;;  %v207_v53 = vld [vmem:[%s2849_s0 + $0xc0] sm:$0xff] }
  0x11   :  { %1753 = vmatpush3.bf16.msra.mxu1 %v2032_v15  ;;  %799 = vmatprep.mubr.bf16.mxu1 %v298_v41  ;;  %v200_v52 = vld [vmem:[%s2849_s0 + $0x88] sm:$0xff]  ;;  %v302_v54 = vpack.c.bf16 %v204_v49, %v197_v48  ;;  %v199_v57 = vld [vmem:[%s2849_s0 + $0x80] sm:$0xff]  ;;  %v206_v58 = vld [vmem:[%s2849_s0 + $0xb8] sm:$0xff] }
  0x12   :  { %1754 = vmatprep.subr.bf16.mxu1 %v2035_v18  ;;  %v305_v55 = vpack.c.bf16 %v207_v53, %v200_v52  ;;  %v2052_v56 = vld [vmem:[%s2850_s1 + $0x108] sm:$0xff]   ;;  %v2053_v59 = vld [vmem:[%s2850_s1 + $0x180] sm:$0xff]   ;;  %v304_v62 = vpack.c.bf16 %v206_v58, %v199_v57  ;;  %v218_v1 = vld [vmem:[%s2849_s0 + $0x118] sm:$0xff] }
  0x13   :  { %1691 = vmatpush3.bf16.msra.mxu0 %v2034_v17  ;;  %v212_v60 = vld [vmem:[%s2849_s0 + $0xe8] sm:$0xff]  ;;  %v219_v61 = vld [vmem:[%s2849_s0 + $0x120] sm:$0xff]  ;;  %v2054_v2 = vld [vmem:[%s2850_s1 + $0x150] sm:$0xff]  }
  0x14   :  { %1692 = vmatprep.subr.bf16.mxu0 %v2037_v20  ;;  %v310_v63 = vpack.c.bf16 %v219_v61, %v212_v60  ;;  %v211_v0 = vld [vmem:[%s2849_s0 + $0xe0] sm:$0xff]  ;;  %v214_v3 = vld [vmem:[%s2849_s0 + $0xf8] sm:$0xff]  ;;  %v221_v4 = vld [vmem:[%s2849_s0 + $0x130] sm:$0xff] }
  0x15   :  { %1755 = vmatpush3.bf16.msra.mxu1 %v2036_v19  ;;  %v312_v5 = vpack.c.bf16 %v221_v4, %v214_v3  ;;  %v2055_v6 = vld [vmem:[%s2850_s1 + $0x110] sm:$0xff]   ;;  %v226_v8 = vld [vmem:[%s2849_s0 + $0x158] sm:$0xff]  ;;  %v309_v10 = vpack.c.bf16 %v218_v1, %v211_v0  ;;  %v220_v11 = vld [vmem:[%s2849_s0 + $0x128] sm:$0xff] }
  0x16   :  { %1756 = vmatprep.subr.bf16.mxu1 %v2039_v22  ;;  %v213_v7 = vld [vmem:[%s2849_s0 + $0xf0] sm:$0xff]  ;;  %v2056_v13 = vld [vmem:[%s2850_s1 + $0x158] sm:$0xff]   ;;  %v228_v14 = vld [vmem:[%s2849_s0 + $0x168] sm:$0xff] }
  0x17   :  { %1693 = vmatpush3.bf16.msra.mxu0 %v2038_v21  ;;  %v233_v9 = vld [vmem:[%s2849_s0 + $0x190] sm:$0xff]  ;;  %v235_v15 = vld [vmem:[%s2849_s0 + $0x1a0] sm:$0xff]  ;;  %v2057_v16 = vld [vmem:[%s2850_s1 + $0x118] sm:$0xff]   ;;  %v311_v17 = vpack.c.bf16 %v220_v11, %v213_v7 }
  0x18   :  { %1694 = vmatprep.subr.bf16.mxu0 %v2041_v24  ;;  %v317_v12 = vpack.c.bf16 %v233_v9, %v226_v8  ;;  %v225_v18 = vld [vmem:[%s2849_s0 + $0x150] sm:$0xff]  ;;  %v232_v19 = vld [vmem:[%s2849_s0 + $0x188] sm:$0xff]  ;;  %v319_v20 = vpack.c.bf16 %v235_v15, %v228_v14  ;;  %v2058_v21 = vld [vmem:[%s2850_s1 + $0x160] sm:$0xff]  }
  0x19   :  { %1757 = vmatpush3.bf16.msra.mxu1 %v2040_v23  ;;  %v240_v22 = vld [vmem:[%s2849_s0 + $0x1c8] sm:$0xff]  ;;  %v247_v23 = vld [vmem:[%s2849_s0 + $0x200] sm:$0xff]  ;;  %v246_v36 = vld [vmem:[%s2849_s0 + $0x1f8] sm:$0xff] }
  0x1a   :  { %1758 = vmatprep.subr.bf16.mxu1 %v2043_v26  ;;  %v2059_v24 = vld [vmem:[%s2850_s1 + $0x120] sm:$0xff]   ;;  %v2060_v31 = vld [vmem:[%s2850_s1 + $0x168] sm:$0xff]   ;;  %v241_v39 = vld [vmem:[%s2849_s0 + $0x1d0] sm:$0xff] }
  0x1b   :  { %1695 = vmatpush3.bf16.msra.mxu0 %v2042_v25  ;;  %v316_v25 = vpack.c.bf16 %v232_v19, %v225_v18  ;;  %v227_v26 = vld [vmem:[%s2849_s0 + $0x160] sm:$0xff]  ;;  %v248_v40 = vld [vmem:[%s2849_s0 + $0x208] sm:$0xff]  ;;  %v2062_v41 = vld [vmem:[%s2850_s1 + $0x170] sm:$0xff]  }
  0x1c   :  { %1696 = vmatprep.subr.bf16.mxu0 %v2045_v28  ;;  %v324_v28 = vpack.c.bf16 %v247_v23, %v240_v22  ;;  %v239_v35 = vld [vmem:[%s2849_s0 + $0x1c0] sm:$0xff]  ;;  %v2063_v43 = vld [vmem:[%s2850_s1 + $0x130] sm:$0xff]   ;;  %v256_v45 = vld [vmem:[%s2849_s0 + $0x248] sm:$0xff]  ;;  %v325_v47 = vpack.c.bf16 %v248_v40, %v241_v39 }
  0x1d   :  { %1759 = vmatpush3.bf16.msra.mxu1 %v2044_v27  ;;  %v234_v27 = vld [vmem:[%s2849_s0 + $0x198] sm:$0xff]  ;;  %v253_v49 = vld [vmem:[%s2849_s0 + $0x230] sm:$0xff]  ;;  %v268_v53 = vld [vmem:[%s2849_s0 + $0x2a8] sm:$0xff] }
  0x1e   :  { %1760 = vmatprep.subr.bf16.mxu1 %v2047_v30  ;;  %v249_v30 = vld [vmem:[%s2849_s0 + $0x210] sm:$0xff]  ;;  %v318_v32 = vpack.c.bf16 %v234_v27, %v227_v26  ;;  %v2064_v48 = vld [vmem:[%s2850_s1 + $0x178] sm:$0xff]   ;;  %v284_v7 = vld [vmem:[%s2849_s0 + $0x328] sm:$0xff] }
  0x1f   :  { %1697 = vmatpush3.bf16.msra.mxu0 %v2046_v29  ;;  %v242_v29 = vld [vmem:[%s2849_s0 + $0x1d8] sm:$0xff]  ;;  %v277_v60 = vld [vmem:[%s2849_s0 + $0x2f0] sm:$0xff]  ;;  %v291_v8 = vld [vmem:[%s2849_s0 + $0x360] sm:$0xff] }
  0x20   :  { %1810 = vmatprep.subr.bf16.mxu0 %v2049_v38  ;;  %v326_v33 = vpack.c.bf16 %v249_v30, %v242_v29  ;;  %v261_v38 = vld [vmem:[%s2849_s0 + $0x270] sm:$0xff]  ;;  %v2065_v52 = vld [vmem:[%s2850_s1 + $0x138] sm:$0xff]   ;;  %v283_v14 = vld [vmem:[%s2849_s0 + $0x320] sm:$0xff] }
  0x21   :  { %1761 = vmatpush3.bf16.msra.mxu1 %v2048_v34  ;;  %v2061_v34 = vld [vmem:[%s2850_s1 + $0x128] sm:$0xff]   ;;  %v262_v57 = vld [vmem:[%s2849_s0 + $0x278] sm:$0xff]  ;;  %v269_v4 = vld [vmem:[%s2849_s0 + $0x2b0] sm:$0xff] }
  0x22   :  { %703 = vmatmul.mubr.bf16.vlgmr.msra.gmra.mrb[0].mxu0 %v295_v37  ;;  %1920 = vmatprep.subr.bf16.mxu1 %v2053_v59  ;;  %v254_v37 = vld [vmem:[%s2849_s0 + $0x238] sm:$0xff]  ;;  %v281_v11 = vld [vmem:[%s2849_s0 + $0x310] sm:$0xff]  ;;  %v196_v18 = vld [vmem:[%s2849_s0 + $0x68] sm:$0xff] }
  0x23   :  { %1811 = vmatpush3.bf16.msra.mxu0 %v2050_v42  ;;  %710 = vmatprep.mubr.bf16.mxu0 %v303_v50  ;;  %v323_v42 = vpack.c.bf16 %v246_v36, %v239_v35  ;;  %v331_v44 = vpack.c.bf16 %v261_v38, %v254_v37  ;;  %v274_v0 = vld [vmem:[%s2849_s0 + $0x2d8] sm:$0xff]  ;;  %v187_v22 = vld [vmem:[%s2849_s0 + $0x20] sm:$0xff]  ;;  %v209_v26 = vld [vmem:[%s2849_s0 + $0xd0] sm:$0xff] }
  0x24   :  { %800 = vmatmul.mubr.bf16.vlgmr.msra.gmra.mrb[0].mxu1 %v297_v46  ;;  %1812 = vmatprep.subr.bf16.mxu0 %v2051_v51  ;;  %v263_v46 = vld [vmem:[%s2849_s0 + $0x280] sm:$0xff]  ;;  %v260_v51 = vld [vmem:[%s2849_s0 + $0x268] sm:$0xff]  ;;  %v282_v1 = vld [vmem:[%s2849_s0 + $0x318] sm:$0xff] }
  0x25   :  { %807 = vmatprep.mubr.bf16.mxu1 %v305_v55  ;;  %1921 = vmatpush3.bf16.msra.mxu1 %v2053_v59  ;;  %v333_v50 = vpack.c.bf16 %v263_v46, %v256_v45  ;;  %v330_v55 = vpack.c.bf16 %v260_v51, %v253_v49  ;;  %v270_v59 = vld [vmem:[%s2849_s0 + $0x2b8] sm:$0xff] }
  0x26   :  { %v290_v15 = vld [vmem:[%s2849_s0 + $0x358] sm:$0xff] }
  0x27   :  { %1813 = vmatpush3.bf16.msra.mxu0 %v2052_v56  ;;  %v255_v56 = vld [vmem:[%s2849_s0 + $0x240] sm:$0xff]  ;;  %v194_v23 = vld [vmem:[%s2849_s0 + $0x58] sm:$0xff] }
  0x28   :  { %1814 = vmatprep.subr.bf16.mxu0 %v2054_v2  ;;  %v332_v61 = vpack.c.bf16 %v262_v57, %v255_v56  ;;  %v289_v2 = vld [vmem:[%s2849_s0 + $0x350] sm:$0xff] }
  0x2a   :  { %711 = vmatmul.mubr.bf16.gmra.mrb[4].mxu0 %v302_v54  ;;  %v275_v54 = vld [vmem:[%s2849_s0 + $0x2e0] sm:$0xff] }
  0x2b   :  { %718 = vmatprep.mubr.bf16.mxu0 %v310_v63  ;;  %1815 = vmatpush3.bf16.msra.mxu0 %v2055_v6  ;;  %v338_v58 = vpack.c.bf16 %v275_v54, %v268_v53  ;;  %v267_v63 = vld [vmem:[%s2849_s0 + $0x2a0] sm:$0xff]  ;;  %v345_v6 = vpack.c.bf16 %v289_v2, %v282_v1 }
  0x2c   :  { %808 = vmatmul.mubr.bf16.gmra.mrb[4].mxu1 %v304_v62  ;;  %1816 = vmatprep.subr.bf16.mxu0 %v2056_v13  ;;  %v340_v62 = vpack.c.bf16 %v277_v60, %v270_v59  ;;  %v337_v3 = vpack.c.bf16 %v274_v0, %v267_v63  ;;  %v188_v13 = vld [vmem:[%s2849_s0 + $0x28] sm:$0xff] }
  0x2d   :  { %815 = vmatprep.mubr.bf16.mxu1 %v312_v5  ;;  %v276_v5 = vld [vmem:[%s2849_s0 + $0x2e8] sm:$0xff] }
  0x2e   :  { %v339_v9 = vpack.c.bf16 %v276_v5, %v269_v4 }
  0x2f   :  { %1817 = vmatpush3.bf16.msra.mxu0 %v2057_v16  ;;  %v195_v16 = vld [vmem:[%s2849_s0 + $0x60] sm:$0xff] }
  0x30   :  { %1818 = vmatprep.subr.bf16.mxu0 %v2058_v21  ;;  %v346_v21 = vpack.c.bf16 %v290_v15, %v283_v14 }
  0x32   :  { %719 = vmatmul.mubr.bf16.gmra.mrb[8].mxu0 %v309_v10  ;;  %v347_v10 = vpack.c.bf16 %v291_v8, %v284_v7 }
  0x33   :  { %726 = vmatprep.mubr.bf16.mxu0 %v317_v12  ;;  %1819 = vmatpush3.bf16.msra.mxu0 %v2059_v24  ;;  %v288_v12 = vld [vmem:[%s2849_s0 + $0x348] sm:$0xff] }
  0x34   :  { %816 = vmatmul.mubr.bf16.gmra.mrb[8].mxu1 %v311_v17  ;;  %1820 = vmatprep.subr.bf16.mxu0 %v2060_v31  ;;  %v189_v17 = vld [vmem:[%s2849_s0 + $0x30] sm:$0xff]  ;;  %v344_v19 = vpack.c.bf16 %v288_v12, %v281_v11 }
  0x35   :  { %823 = vmatprep.mubr.bf16.mxu1 %v319_v20  ;;  %v300_v20 = vpack.c.bf16 %v195_v16, %v188_v13  ;;  %v301_v24 = vpack.c.bf16 %v196_v18, %v189_v17 }
  0x37   :  { %1821 = vmatpush3.bf16.msra.mxu0 %v2061_v34 }
  0x38   :  { %1822 = vmatprep.subr.bf16.mxu0 %v2062_v41 }
  0x3a   :  { %727 = vmatmul.mubr.bf16.gmra.mrb[12].mxu0 %v316_v25  ;;  %v202_v25 = vld [vmem:[%s2849_s0 + $0x98] sm:$0xff] }
  0x3b   :  { %734 = vmatprep.mubr.bf16.mxu0 %v324_v28  ;;  %1823 = vmatpush3.bf16.msra.mxu0 %v2063_v43 }
  0x3c   :  { %824 = vmatmul.mubr.bf16.gmra.mrb[12].mxu1 %v318_v32  ;;  %1824 = vmatprep.subr.bf16.mxu0 %v2064_v48 }
  0x3d   :  { %831 = vmatprep.mubr.bf16.mxu1 %v326_v33 }
  0x3f   :  { %1825 = vmatpush3.bf16.msra.mxu0 %v2065_v52 }
  0x42   :  { %735 = vmatmul.mubr.bf16.gmra.mrb[16].mxu0 %v323_v42 }
  0x43   :  { %742 = vmatprep.mubr.bf16.mxu0 %v331_v44 }
  0x44   :  { %832 = vmatmul.mubr.bf16.gmra.mrb[16].mxu1 %v325_v47 }
  0x45   :  { %839 = vmatprep.mubr.bf16.mxu1 %v333_v50 }
  0x4a   :  { %743 = vmatmul.mubr.bf16.gmra.mrb[20].mxu0 %v330_v55 }
  0x4b   :  { %750 = vmatprep.mubr.bf16.mxu0 %v338_v58 }
  0x4c   :  { %840 = vmatmul.mubr.bf16.gmra.mrb[20].mxu1 %v332_v61 }
  0x4d   :  { %847 = vmatprep.mubr.bf16.mxu1 %v340_v62 }
  0x52   :  { %751 = vmatmul.mubr.bf16.gmra.mrb[24].mxu0 %v337_v3 }
  0x53   :  { %758 = vmatprep.mubr.bf16.mxu0 %v345_v6 }
  0x54   :  { %848 = vmatmul.mubr.bf16.gmra.mrb[24].mxu1 %v339_v9 }
  0x55   :  { %855 = vmatprep.mubr.bf16.mxu1 %v347_v10 }
  0x5a   :  { %759 = vmatmul.mubr.bf16.gmra.mrb[28].mxu0 %v344_v19 }
  0x5b   :  { %896 = vmatprep.mubr.bf16.mxu0 %v300_v20 }
  0x5c   :  { %15 = vsyncpa [#allocation4], 0  ;;  %856 = vmatmul.mubr.bf16.gmra.mrb[28].mxu1 %v346_v21  ;;  %v299_v27 = vpack.c.bf16 %v194_v23, %v187_v22  ;;  %v203_v28 = vld [vmem:[%s2849_s0 + $0xa0] sm:$0xff]  ;;  %v210_v29 = vld [vmem:[%s2849_s0 + $0xd8] sm:$0xff]  ;;  %v307_v30 = vpack.c.bf16 %v209_v26, %v202_v25 }
  0x5d   :  { %1922 = vmatprep.mubr.msk.bf16.mxu1 %vm645_vm0, %v301_v24  ;;  %v217_v31 = vld [vmem:[%s2849_s0 + $0x110] sm:$0xff]  ;;  %v224_v32 = vld [vmem:[%s2849_s0 + $0x148] sm:$0xff]  ;;  %v308_v33 = vpack.c.bf16 %v210_v29, %v203_v28  ;;  %v223_v38 = vld [vmem:[%s2849_s0 + $0x140] sm:$0xff] }
  0x5e   :  { %v315_v34 = vpack.c.bf16 %v224_v32, %v217_v31  ;;  %v201_v35 = vld [vmem:[%s2849_s0 + $0x90] sm:$0xff]  ;;  %v208_v36 = vld [vmem:[%s2849_s0 + $0xc8] sm:$0xff]  ;;  %v231_v40 = vld [vmem:[%s2849_s0 + $0x180] sm:$0xff] }
  0x5f   :  { %v216_v37 = vld [vmem:[%s2849_s0 + $0x108] sm:$0xff]  ;;  %v306_v39 = vpack.c.bf16 %v208_v36, %v201_v35  ;;  %v238_v41 = vld [vmem:[%s2849_s0 + $0x1b8] sm:$0xff]  ;;  %v245_v43 = vld [vmem:[%s2849_s0 + $0x1f0] sm:$0xff] }
  0x60   :  { %v314_v42 = vpack.c.bf16 %v223_v38, %v216_v37  ;;  %v252_v44 = vld [vmem:[%s2849_s0 + $0x228] sm:$0xff]  ;;  %v322_v45 = vpack.c.bf16 %v238_v41, %v231_v40  ;;  %v215_v47 = vld [vmem:[%s2849_s0 + $0x100] sm:$0xff]  ;;  %v222_v48 = vld [vmem:[%s2849_s0 + $0x138] sm:$0xff] }
  0x61   :  { %v329_v46 = vpack.c.bf16 %v252_v44, %v245_v43  ;;  %v230_v49 = vld [vmem:[%s2849_s0 + $0x178] sm:$0xff]  ;;  %v237_v50 = vld [vmem:[%s2849_s0 + $0x1b0] sm:$0xff]  ;;  %v313_v51 = vpack.c.bf16 %v222_v48, %v215_v47  ;;  %v259_v52 = vld [vmem:[%s2849_s0 + $0x260] sm:$0xff] }
  0x62   :  { %897 = vmatmul.mubr.bf16.vlgmr.msra.gmra.mrb[32].mxu0 %v299_v27  ;;  %v266_v53 = vld [vmem:[%s2849_s0 + $0x298] sm:$0xff]  ;;  %v321_v54 = vpack.c.bf16 %v237_v50, %v230_v49  ;;  %v273_v55 = vld [vmem:[%s2849_s0 + $0x2d0] sm:$0xff]  ;;  %v280_v56 = vld [vmem:[%s2849_s0 + $0x308] sm:$0xff] }
  0x63   :  { %904 = vmatprep.mubr.bf16.mxu0 %v307_v30  ;;  %v336_v57 = vpack.c.bf16 %v266_v53, %v259_v52  ;;  %v343_v58 = vpack.c.bf16 %v280_v56, %v273_v55  ;;  %v229_v59 = vld [vmem:[%s2849_s0 + $0x170] sm:$0xff]  ;;  %v236_v60 = vld [vmem:[%s2849_s0 + $0x1a8] sm:$0xff]  ;;  %v251_v62 = vld [vmem:[%s2849_s0 + $0x220] sm:$0xff] }
  0x64   :  { %1923 = vmatmul.mubr.msk.bf16.vlgmr.msra.gmra.mrb[32].mxu1 %vm645_vm0, %v308_v33  ;;  %v244_v61 = vld [vmem:[%s2849_s0 + $0x1e8] sm:$0xff]  ;;  %v320_v63 = vpack.c.bf16 %v236_v60, %v229_v59  ;;  %v287_v0 = vld [vmem:[%s2849_s0 + $0x340] sm:$0xff]  ;;  %v294_v1 = vld [vmem:[%s2849_s0 + $0x378] sm:$0xff] }
  0x65   :  { %1926 = vmatprep.mubr.msk.bf16.mxu1 %vm645_vm0, %v315_v34  ;;  %v328_v2 = vpack.c.bf16 %v251_v62, %v244_v61  ;;  %v350_v3 = vpack.c.bf16 %v294_v1, %v287_v0  ;;  %v243_v4 = vld [vmem:[%s2849_s0 + $0x1e0] sm:$0xff]  ;;  %v250_v5 = vld [vmem:[%s2849_s0 + $0x218] sm:$0xff]  ;;  %v265_v7 = vld [vmem:[%s2849_s0 + $0x290] sm:$0xff] }
  0x66   :  { %v258_v6 = vld [vmem:[%s2849_s0 + $0x258] sm:$0xff]  ;;  %v327_v8 = vpack.c.bf16 %v250_v5, %v243_v4  ;;  %v257_v10 = vld [vmem:[%s2849_s0 + $0x250] sm:$0xff]  ;;  %v264_v11 = vld [vmem:[%s2849_s0 + $0x288] sm:$0xff] }
  0x67   :  { %v335_v9 = vpack.c.bf16 %v265_v7, %v258_v6  ;;  %v272_v12 = vld [vmem:[%s2849_s0 + $0x2c8] sm:$0xff]  ;;  %v279_v13 = vld [vmem:[%s2849_s0 + $0x300] sm:$0xff]  ;;  %v334_v14 = vpack.c.bf16 %v264_v11, %v257_v10  ;;  %v278_v17 = vld [vmem:[%s2849_s0 + $0x2f8] sm:$0xff] }
  0x68   :  { %v342_v15 = vpack.c.bf16 %v279_v13, %v272_v12  ;;  %v271_v16 = vld [vmem:[%s2849_s0 + $0x2c0] sm:$0xff]  ;;  %v286_v18 = vld [vmem:[%s2849_s0 + $0x338] sm:$0xff]  ;;  %v293_v19 = vld [vmem:[%s2849_s0 + $0x370] sm:$0xff] }
  0x69   :  { %v341_v20 = vpack.c.bf16 %v278_v17, %v271_v16  ;;  %v349_v21 = vpack.c.bf16 %v293_v19, %v286_v18  ;;  %v285_v22 = vld [vmem:[%s2849_s0 + $0x330] sm:$0xff]  ;;  %v292_v23 = vld [vmem:[%s2849_s0 + $0x368] sm:$0xff]  ;;  %v2066_v25 = vld [vmem:[%s2852_s3] sm:$0xff]   ;;  %s2104_s0 = smov [#allocation3]  }
  0x6a   :  { %905 = vmatmul.mubr.bf16.gmra.mrb[36].mxu0 %v306_v39  ;;  %v348_v24 = vpack.c.bf16 %v292_v23, %v285_v22  ;;  %1938 = vmatprep.subr.bf16.mxu1 %v2066_v25  ;;  %v2067_v26 = vld [vmem:[%s2852_s3 + $0x8] sm:$0xff]   ;;  %v2068_v27 = vld [vmem:[%s2852_s3 + $0x10] sm:$0xff]   ;;  %v2069_v28 = vld [vmem:[%s2852_s3 + $0x18] sm:$0xff]   ;;  %s1593_s16 = sshll.u32 %s2104_s0, 4  ;;  %s1594_s16 = int_to_ptr.vmem [resolvable:$true] %s1593_s16 }
  0x6b   :  { %912 = vmatprep.mubr.bf16.mxu0 %v314_v42  ;;  %1939 = vmatpush3.bf16.msra.mxu1 %v2066_v25  ;;  %v2070_v29 = vld [vmem:[%s2852_s3 + $0x20] sm:$0xff]   ;;  %v2071_v30 = vld [vmem:[%s2852_s3 + $0x28] sm:$0xff]   ;;  %v2072_v31 = vld [vmem:[%s2852_s3 + $0x30] sm:$0xff]   ;;  %s2078_s17 = scalar_lea.vmem %s1594_s16, 16  ;;  %s2082_s1 = scalar_lea.vmem %s1594_s16, 32 }
  0x6c   :  { %1927 = vmatmul.mubr.msk.bf16.gmra.mrb[36].mxu1 %vm645_vm0, %v322_v45  ;;  %1940 = vmatprep.subr.bf16.mxu1 %v2067_v26  ;;  %v2073_v32 = vld [vmem:[%s2852_s3 + $0x38] sm:$0xff]   ;;  %v2673_v34 = vld [vmem:[%s2851_s2] ss:$0 sm:$0xff]  ;;  %v2075_v50 = vld [vmem:[%s2854_s5 + $0x8] sm:$0xff]   ;;  %p2079_p0 = scmp.ne.s32.totalorder %s1594_s16, %s2078_s17  ;;  %p2083_p1 = scmp.lt.s32.totalorder %s1594_s16, %s1594_s16 }
  0x6d   :  { %1930 = vmatprep.mubr.msk.bf16.mxu1 %vm645_vm0, %v329_v46  ;;  %v2074_v49 = vld [vmem:[%s2854_s5] sm:$0xff]   ;;  %v2077_v4 = vld [vmem:[%s2854_s5 + $0x18] sm:$0xff]   ;;  %p2084_p2 = scmp.lt.s32.totalorder %s2082_s1, %s2078_s17 }
  0x6e   :  { %1970 = vmatprep.subr.bf16.mxu0 %v2074_v49 }
  0x6f   :  { %1941 = vmatpush3.bf16.msra.mxu1 %v2067_v26  ;;  %1971 = vmatpush3.bf16.msra.mxu0 %v2074_v49  ;;  %p2085_p3 = por %p2084_p2, %p2083_p1 }
  0x70   :  { %1942 = vmatprep.subr.bf16.mxu1 %v2068_v27  ;;  %1972 = vmatprep.subr.bf16.mxu0 %v2075_v50 }
  0x71   :  { %p2086_p4 = pnand %p2085_p3, %p2079_p0 }
  0x72   :  { %913 = vmatmul.mubr.bf16.gmra.mrb[40].mxu0 %v313_v51 }
  0x73   :  { %920 = vmatprep.mubr.bf16.mxu0 %v321_v54  ;;  %1943 = vmatpush3.bf16.msra.mxu1 %v2068_v27 }
  0x74   :  { %1931 = vmatmul.mubr.msk.bf16.gmra.mrb[40].mxu1 %vm645_vm0, %v336_v57  ;;  %1944 = vmatprep.subr.bf16.mxu1 %v2069_v28 }
  0x75   :  { %1934 = vmatprep.mubr.msk.bf16.mxu1 %vm645_vm0, %v343_v58  ;;  %v2076_v58 = vld [vmem:[%s2854_s5 + $0x10] sm:$0xff]   ;;  %1973 = vmatpush3.bf16.msra.mxu0 %v2075_v50 }
  0x76   :  { %1974 = vmatprep.subr.bf16.mxu0 %v2076_v58 }
  0x77   :  { %1945 = vmatpush3.bf16.msra.mxu1 %v2069_v28 }
  0x78   :  { %1946 = vmatprep.subr.bf16.mxu1 %v2070_v29 }
  0x79   :  { %1975 = vmatpush3.bf16.msra.mxu0 %v2076_v58 }
  0x7a   :  { %921 = vmatmul.mubr.bf16.gmra.mrb[44].mxu0 %v320_v63  ;;  %1976 = vmatprep.subr.bf16.mxu0 %v2077_v4 }
  0x7b   :  { %928 = vmatprep.mubr.bf16.mxu0 %v328_v2  ;;  %1947 = vmatpush3.bf16.msra.mxu1 %v2070_v29 }
  0x7c   :  { %1935 = vmatmul.mubr.msk.bf16.gmra.mrb[44].mxu1 %vm645_vm0, %v350_v3  ;;  %1948 = vmatprep.subr.bf16.mxu1 %v2071_v30 }
  0x7d   :  { %1977 = vmatpush3.bf16.msra.mxu0 %v2077_v4 }
  0x7f   :  { %1949 = vmatpush3.bf16.msra.mxu1 %v2071_v30 }
  0x80   :  { %1950 = vmatprep.subr.bf16.mxu1 %v2072_v31 }
  0x82   :  { %929 = vmatmul.mubr.bf16.gmra.mrb[48].mxu0 %v327_v8 }
  0x83   :  { %936 = vmatprep.mubr.bf16.mxu0 %v335_v9  ;;  %1951 = vmatpush3.bf16.msra.mxu1 %v2072_v31 }
  0x84   :  { %1952 = vmatprep.subr.bf16.mxu1 %v2073_v32 }
  0x87   :  { %1953 = vmatpush3.bf16.msra.mxu1 %v2073_v32 }
  0x8a   :  { %937 = vmatmul.mubr.bf16.gmra.mrb[52].mxu0 %v334_v14 }
  0x8b   :  { %944 = vmatprep.mubr.bf16.mxu0 %v342_v15 }
  0x92   :  { %945 = vmatmul.mubr.bf16.gmra.mrb[56].mxu0 %v341_v20 }
  0x93   :  { %952 = vmatprep.mubr.bf16.mxu0 %v349_v21 }
  0x9a   :  { %953 = vmatmul.mubr.bf16.gmra.mrb[60].mxu0 %v348_v24 }
  0xf5   :  { %v1698_v33 = vpop.f32.mrb[0].mxu0 }
  0xf6   :  { %v1699_v35 = vpop.f32.mrb[1].mxu0 }
  0xf7   :  { %v1700_v36 = vadd.f32 %v1699_v35, %v1698_v33  ;;  %v1701_v37 = vpop.f32.mrb[2].mxu0  ;;  %v1762_v38 = vpop.f32.mrb[0].mxu1 }
  0xf8   :  { %v1702_v39 = vpop.f32.mrb[3].mxu0  ;;  %v1763_v42 = vpop.f32.mrb[1].mxu1 }
  0xf9   :  { %v705_v40 = vadd.f32 %v1700_v36, %v2673_v34  ;;  %v1703_v41 = vadd.f32 %v1702_v39, %v1701_v37  ;;  %v1764_v43 = vadd.f32 %v1763_v42, %v1762_v38  ;;  %v1765_v44 = vpop.f32.mrb[2].mxu1 }
  0xfa   :  { %v1766_v46 = vpop.f32.mrb[3].mxu1 }
  0xfb   :  { %v708_v45 = vadd.f32 %v1703_v41, %v2673_v34  ;;  %v2677_v47 = vadd.f32 %v1764_v43, %v705_v40  ;;  %v1767_v48 = vadd.f32 %v1766_v46, %v1765_v44 }
  0xfd   :  { %v1704_v51 = vpop.f32.mrb[4].mxu0  ;;  %v2685_v52 = vadd.f32 %v1767_v48, %v708_v45 }
  0xfe   :  { %v1705_v53 = vpop.f32.mrb[5].mxu0 }
  0xff   :  { %v1706_v54 = vadd.f32 %v1705_v53, %v1704_v51  ;;  %v1707_v55 = vpop.f32.mrb[6].mxu0  ;;  %v1768_v56 = vpop.f32.mrb[4].mxu1 }
 0x100   :  { %v1708_v57 = vpop.f32.mrb[7].mxu0  ;;  %v1769_v61 = vpop.f32.mrb[5].mxu1 }
 0x101   :  { %v713_v59 = vadd.f32 %v1706_v54, %v2673_v34  ;;  %v1709_v60 = vadd.f32 %v1708_v57, %v1707_v55  ;;  %v1770_v62 = vadd.f32 %v1769_v61, %v1768_v56  ;;  %v1771_v63 = vpop.f32.mrb[6].mxu1 }
 0x102   :  { %v1772_v1 = vpop.f32.mrb[7].mxu1 }
 0x103   :  { %v716_v0 = vadd.f32 %v1709_v60, %v2673_v34  ;;  %v2692_v2 = vadd.f32 %v1770_v62, %v713_v59  ;;  %v1773_v3 = vadd.f32 %v1772_v1, %v1771_v63 }
 0x105   :  { %v1710_v5 = vpop.f32.mrb[8].mxu0  ;;  %v2697_v6 = vadd.f32 %v1773_v3, %v716_v0 }
 0x106   :  { %v1711_v7 = vpop.f32.mrb[9].mxu0 }
 0x107   :  { %v1712_v8 = vadd.f32 %v1711_v7, %v1710_v5  ;;  %v1713_v9 = vpop.f32.mrb[10].mxu0  ;;  %v1774_v10 = vpop.f32.mrb[8].mxu1 }
 0x108   :  { %v1714_v11 = vpop.f32.mrb[11].mxu0  ;;  %v1775_v14 = vpop.f32.mrb[9].mxu1 }
 0x109   :  { %v721_v12 = vadd.f32 %v1712_v8, %v2673_v34  ;;  %v1715_v13 = vadd.f32 %v1714_v11, %v1713_v9  ;;  %v1776_v15 = vadd.f32 %v1775_v14, %v1774_v10  ;;  %v1777_v16 = vpop.f32.mrb[10].mxu1 }
 0x10a   :  { %v1778_v18 = vpop.f32.mrb[11].mxu1 }
 0x10b   :  { %v724_v17 = vadd.f32 %v1715_v13, %v2673_v34  ;;  %v2701_v19 = vadd.f32 %v1776_v15, %v721_v12  ;;  %v1779_v20 = vadd.f32 %v1778_v18, %v1777_v16 }
 0x10d   :  { %v1716_v21 = vpop.f32.mrb[12].mxu0  ;;  %v2703_v22 = vadd.f32 %v1779_v20, %v724_v17 }
 0x10e   :  { %v1717_v23 = vpop.f32.mrb[13].mxu0 }
 0x10f   :  { %v1718_v24 = vadd.f32 %v1717_v23, %v1716_v21  ;;  %v1719_v25 = vpop.f32.mrb[14].mxu0  ;;  %v1780_v26 = vpop.f32.mrb[12].mxu1 }
 0x110   :  { %v1720_v27 = vpop.f32.mrb[15].mxu0  ;;  %v1781_v30 = vpop.f32.mrb[13].mxu1 }
 0x111   :  { %v729_v28 = vadd.f32 %v1718_v24, %v2673_v34  ;;  %v1721_v29 = vadd.f32 %v1720_v27, %v1719_v25  ;;  %v1782_v31 = vadd.f32 %v1781_v30, %v1780_v26  ;;  %v1783_v32 = vpop.f32.mrb[14].mxu1 }
 0x112   :  { %v1784_v35 = vpop.f32.mrb[15].mxu1 }
 0x113   :  { %v732_v33 = vadd.f32 %v1721_v29, %v2673_v34  ;;  %v2707_v36 = vadd.f32 %v1782_v31, %v729_v28  ;;  %v1785_v37 = vadd.f32 %v1784_v35, %v1783_v32 }
 0x115   :  { %v1722_v38 = vpop.f32.mrb[16].mxu0  ;;  %v2709_v39 = vadd.f32 %v1785_v37, %v732_v33 }
 0x116   :  { %v1723_v40 = vpop.f32.mrb[17].mxu0 }
 0x117   :  { %v1724_v41 = vadd.f32 %v1723_v40, %v1722_v38  ;;  %v1725_v42 = vpop.f32.mrb[18].mxu0  ;;  %v1786_v43 = vpop.f32.mrb[16].mxu1 }
 0x118   :  { %v1726_v44 = vpop.f32.mrb[19].mxu0  ;;  %v1787_v48 = vpop.f32.mrb[17].mxu1 }
 0x119   :  { %v737_v45 = vadd.f32 %v1724_v41, %v2673_v34  ;;  %v1727_v46 = vadd.f32 %v1726_v44, %v1725_v42  ;;  %v1788_v49 = vadd.f32 %v1787_v48, %v1786_v43  ;;  %v1789_v50 = vpop.f32.mrb[18].mxu1 }
 0x11a   :  { %v1790_v53 = vpop.f32.mrb[19].mxu1 }
 0x11b   :  { %v740_v51 = vadd.f32 %v1727_v46, %v2673_v34  ;;  %v2713_v54 = vadd.f32 %v1788_v49, %v737_v45  ;;  %v1791_v55 = vadd.f32 %v1790_v53, %v1789_v50 }
 0x11d   :  { %v1728_v56 = vpop.f32.mrb[20].mxu0  ;;  %v2715_v57 = vadd.f32 %v1791_v55, %v740_v51 }
 0x11e   :  { %v1729_v58 = vpop.f32.mrb[21].mxu0 }
 0x11f   :  { %v1730_v59 = vadd.f32 %v1729_v58, %v1728_v56  ;;  %v1731_v60 = vpop.f32.mrb[22].mxu0  ;;  %v1792_v61 = vpop.f32.mrb[20].mxu1 }
 0x120   :  { %v1732_v62 = vpop.f32.mrb[23].mxu0  ;;  %v1793_v1 = vpop.f32.mrb[21].mxu1 }
 0x121   :  { %v745_v63 = vadd.f32 %v1730_v59, %v2673_v34  ;;  %v1733_v0 = vadd.f32 %v1732_v62, %v1731_v60  ;;  %v1794_v3 = vadd.f32 %v1793_v1, %v1792_v61  ;;  %v1795_v4 = vpop.f32.mrb[22].mxu1 }
 0x122   :  { %v1796_v7 = vpop.f32.mrb[23].mxu1 }
 0x123   :  { %v748_v5 = vadd.f32 %v1733_v0, %v2673_v34  ;;  %v2719_v8 = vadd.f32 %v1794_v3, %v745_v63  ;;  %v1797_v9 = vadd.f32 %v1796_v7, %v1795_v4 }
 0x125   :  { %v1734_v10 = vpop.f32.mrb[24].mxu0  ;;  %v2721_v11 = vadd.f32 %v1797_v9, %v748_v5 }
 0x126   :  { %v1735_v12 = vpop.f32.mrb[25].mxu0 }
 0x127   :  { %v1736_v13 = vadd.f32 %v1735_v12, %v1734_v10  ;;  %v1737_v14 = vpop.f32.mrb[26].mxu0  ;;  %v1798_v15 = vpop.f32.mrb[24].mxu1 }
 0x128   :  { %v1738_v16 = vpop.f32.mrb[27].mxu0  ;;  %v1799_v20 = vpop.f32.mrb[25].mxu1 }
 0x129   :  { %v753_v17 = vadd.f32 %v1736_v13, %v2673_v34  ;;  %v1739_v18 = vadd.f32 %v1738_v16, %v1737_v14  ;;  %v1800_v21 = vadd.f32 %v1799_v20, %v1798_v15  ;;  %v1801_v23 = vpop.f32.mrb[26].mxu1 }
 0x12a   :  { %v1802_v25 = vpop.f32.mrb[27].mxu1 }
 0x12b   :  { %v756_v24 = vadd.f32 %v1739_v18, %v2673_v34  ;;  %v2725_v26 = vadd.f32 %v1800_v21, %v753_v17  ;;  %v1803_v27 = vadd.f32 %v1802_v25, %v1801_v23 }
 0x12d   :  { %v1740_v28 = vpop.f32.mrb[28].mxu0  ;;  %v2727_v29 = vadd.f32 %v1803_v27, %v756_v24 }
 0x12e   :  { %v1741_v30 = vpop.f32.mrb[29].mxu0 }
 0x12f   :  { %v1742_v31 = vadd.f32 %v1741_v30, %v1740_v28  ;;  %v1743_v32 = vpop.f32.mrb[30].mxu0  ;;  %v1804_v33 = vpop.f32.mrb[28].mxu1 }
 0x130   :  { %v1744_v35 = vpop.f32.mrb[31].mxu0  ;;  %v1805_v40 = vpop.f32.mrb[29].mxu1 }
 0x131   :  { %v761_v37 = vadd.f32 %v1742_v31, %v2673_v34  ;;  %v1745_v38 = vadd.f32 %v1744_v35, %v1743_v32  ;;  %v1806_v41 = vadd.f32 %v1805_v40, %v1804_v33  ;;  %v1807_v42 = vpop.f32.mrb[30].mxu1 }
 0x132   :  { %v1808_v44 = vpop.f32.mrb[31].mxu1 }
 0x133   :  { %v764_v43 = vadd.f32 %v1745_v38, %v2673_v34  ;;  %v2731_v45 = vadd.f32 %v1806_v41, %v761_v37  ;;  %v1809_v46 = vadd.f32 %v1808_v44, %v1807_v42 }
 0x135   :  { %v1826_v48 = vpop.f32.mrb[32].mxu0  ;;  %v2733_v49 = vadd.f32 %v1809_v46, %v764_v43 }
 0x136   :  { %v1827_v50 = vpop.f32.mrb[33].mxu0 }
 0x137   :  { %v1828_v51 = vadd.f32 %v1827_v50, %v1826_v48  ;;  %v1829_v53 = vpop.f32.mrb[34].mxu0  ;;  %v1924_v56 = vpop.f32.mrb[32].mxu1 }
 0x138   :  { %v1830_v55 = vpop.f32.mrb[35].mxu0  ;;  %v995_v60 = vpop.f32.mrb[33].mxu1 }
 0x139   :  { %v1831_v58 = vadd.f32 %v1830_v55, %v1829_v53  ;;  %v899_v59 = vadd.f32 %v1828_v51, %v2677_v47  ;;  %v1925_v61 = vpop.f32.mrb[34].mxu1 }
 0x13a   :  { %v998_v63 = vpop.f32.mrb[35].mxu1 }
 0x13b   :  { %v996_v62 = vadd.f32 %v995_v60, %v899_v59  ;;  %v902_v34 = vadd.f32 %v1831_v58, %v2685_v52 }
 0x13d   :  { %v1074_v0 = vmul.f32 0.01, %v996_v62  ;;  %v999_v1 = vadd.f32 %v998_v63, %v902_v34  ;;  %v1832_v3 = vpop.f32.mrb[36].mxu0  ;;  %vm1058_vm1 = vcmp.gt.f32.partialorder %v996_v62, 0.0 }
 0x13e   :  { %v1833_v4 = vpop.f32.mrb[37].mxu0 }
 0x13f   :  { %vm1059_vm2 = vcmp.gt.f32.partialorder %v999_v1, 0.0  ;;  %v1075_v5 = vmul.f32 0.01, %v999_v1  ;;  %v1834_v7 = vadd.f32 %v1833_v4, %v1832_v3  ;;  %v1835_v9 = vpop.f32.mrb[38].mxu0  ;;  %v1928_v12 = vpop.f32.mrb[36].mxu1  ;;  %v1090_v14 = vsel %vm1058_vm1, %v996_v62, %v1074_v0 }
 0x140   :  { %v1836_v10 = vpop.f32.mrb[39].mxu0  ;;  %v1011_v16 = vpop.f32.mrb[37].mxu1 }
 0x141   :  { %v907_v13 = vadd.f32 %v1834_v7, %v2692_v2  ;;  %v1837_v47 = vadd.f32 %v1836_v10, %v1835_v9  ;;  %v1091_v15 = vsel %vm1059_vm2, %v999_v1, %v1075_v5  ;;  %v1929_v52 = vpop.f32.mrb[38].mxu1 }
 0x142   :  { %v1106_v17 = vpack.c.bf16 %v1091_v15, %v1090_v14  ;;  %v1014_v21 = vpop.f32.mrb[39].mxu1 }
 0x143   :  { %v1004_v18 = vadd.f32 %v1924_v56, %v907_v13  ;;  %v910_v20 = vadd.f32 %v1837_v47, %v2697_v6 }
 0x144   :  { %1954 = vmatprep.mubr.bf16.mxu1 %v1106_v17 }
 0x145   :  { %v1076_v23 = vmul.f32 0.01, %v1004_v18  ;;  %v1007_v24 = vadd.f32 %v1925_v61, %v910_v20  ;;  %v1838_v25 = vpop.f32.mrb[40].mxu0  ;;  %vm1060_vm3 = vcmp.gt.f32.partialorder %v1004_v18, 0.0 }
 0x146   :  { %v1839_v27 = vpop.f32.mrb[41].mxu0 }
 0x147   :  { %vm1061_vm4 = vcmp.gt.f32.partialorder %v1007_v24, 0.0  ;;  %v1077_v28 = vmul.f32 0.01, %v1007_v24  ;;  %v1840_v30 = vadd.f32 %v1839_v27, %v1838_v25  ;;  %v1841_v2 = vpop.f32.mrb[42].mxu0  ;;  %v2739_v32 = vpop.f32.mrb[40].mxu1  ;;  %v1092_v33 = vsel %vm1060_vm3, %v1004_v18, %v1076_v23 }
 0x148   :  { %v1842_v31 = vpop.f32.mrb[43].mxu0  ;;  %v1027_v6 = vpop.f32.mrb[41].mxu1 }
 0x149   :  { %v1093_v35 = vsel %vm1061_vm4, %v1007_v24, %v1077_v28  ;;  %v1843_v37 = vadd.f32 %v1842_v31, %v1841_v2  ;;  %v915_v38 = vadd.f32 %v1840_v30, %v2701_v19  ;;  %v2742_v41 = vpop.f32.mrb[42].mxu1 }
 0x14a   :  { %v1107_v40 = vpack.c.bf16 %v1093_v35, %v1092_v33  ;;  %v1030_v44 = vpop.f32.mrb[43].mxu1 }
 0x14b   :  { %v1012_v42 = vadd.f32 %v1011_v16, %v915_v38  ;;  %v918_v43 = vadd.f32 %v1843_v37, %v2703_v22 }
 0x14c   :  { %1955 = vmatmul.mubr.bf16.vlgmr.msra.gmra.mrb[48].mxu1 %v1107_v40 }
 0x14d   :  { %v1078_v46 = vmul.f32 0.01, %v1012_v42  ;;  %v1015_v48 = vadd.f32 %v1014_v21, %v918_v43  ;;  %v1844_v50 = vpop.f32.mrb[44].mxu0  ;;  %vm1062_vm5 = vcmp.gt.f32.partialorder %v1012_v42, 0.0 }
 0x14e   :  { %v1845_v51 = vpop.f32.mrb[45].mxu0 }
 0x14f   :  { %vm1063_vm6 = vcmp.gt.f32.partialorder %v1015_v48, 0.0  ;;  %v1079_v53 = vmul.f32 0.01, %v1015_v48  ;;  %v1846_v55 = vadd.f32 %v1845_v51, %v1844_v50  ;;  %v1847_v56 = vpop.f32.mrb[46].mxu0  ;;  %v2745_v19 = vpop.f32.mrb[44].mxu1  ;;  %v1094_v61 = vsel %vm1062_vm5, %v1012_v42, %v1078_v46 }
 0x150   :  { %v1848_v58 = vpop.f32.mrb[47].mxu0  ;;  %v1043_v22 = vpop.f32.mrb[45].mxu1  ;;  %vm1339_vm5 = vcmask 523264  }
 0x151   :  { %v923_v59 = vadd.f32 %v1846_v55, %v2707_v36  ;;  %v1849_v60 = vadd.f32 %v1848_v58, %v1847_v56  ;;  %v1095_v62 = vsel %vm1063_vm6, %v1015_v48, %v1079_v53  ;;  %v2748_v63 = vpop.f32.mrb[46].mxu1 }
 0x152   :  { %v1108_v34 = vpack.c.bf16 %v1095_v62, %v1094_v61  ;;  %v1046_v3 = vpop.f32.mrb[47].mxu1 }
 0x153   :  { %v1020_v0 = vadd.f32 %v1928_v12, %v923_v59  ;;  %v926_v1 = vadd.f32 %v1849_v60, %v2709_v39 }
 0x154   :  { %1958 = vmatprep.mubr.bf16.mxu1 %v1108_v34 }
 0x155   :  { %v1080_v4 = vmul.f32 0.01, %v1020_v0  ;;  %v1023_v5 = vadd.f32 %v1929_v52, %v926_v1  ;;  %v1850_v7 = vpop.f32.mrb[48].mxu0  ;;  %vm1064_vm7 = vcmp.gt.f32.partialorder %v1020_v0, 0.0 }
 0x156   :  { %v1851_v9 = vpop.f32.mrb[49].mxu0 }
 0x157   :  { %v1081_v10 = vmul.f32 0.01, %v1023_v5  ;;  %v1852_v13 = vadd.f32 %v1851_v9, %v1850_v7  ;;  %v1853_v36 = vpop.f32.mrb[50].mxu0  ;;  %vm1065_vm8 = vcmp.gt.f32.partialorder %v1023_v5, 0.0  ;;  %v1096_v16 = vsel %vm1064_vm7, %v1020_v0, %v1080_v4 }
 0x158   :  { %v1854_v47 = vpop.f32.mrb[51].mxu0 }
 0x159   :  { %v1855_v14 = vadd.f32 %v1854_v47, %v1853_v36  ;;  %v931_v15 = vadd.f32 %v1852_v13, %v2713_v54  ;;  %v1097_v17 = vsel %vm1065_vm8, %v1023_v5, %v1081_v10 }
 0x15a   :  { %v1109_v12 = vpack.c.bf16 %v1097_v17, %v1096_v16 }
 0x15b   :  { %v1028_v18 = vadd.f32 %v1027_v6, %v931_v15  ;;  %v934_v39 = vadd.f32 %v1855_v14, %v2715_v57 }
 0x15c   :  { %1959 = vmatmul.mubr.bf16.gmra.mrb[52].mxu1 %v1109_v12 }
 0x15d   :  { %v1082_v20 = vmul.f32 0.01, %v1028_v18  ;;  %v1031_v52 = vadd.f32 %v1030_v44, %v934_v39  ;;  %v1856_v21 = vpop.f32.mrb[52].mxu0  ;;  %vm1066_vm9 = vcmp.gt.f32.partialorder %v1028_v18, 0.0 }
 0x15e   :  { %v1857_v23 = vpop.f32.mrb[53].mxu0 }
 0x15f   :  { %vm1067_vm10 = vcmp.gt.f32.partialorder %v1031_v52, 0.0  ;;  %v1083_v24 = vmul.f32 0.01, %v1031_v52  ;;  %v1858_v25 = vadd.f32 %v1857_v23, %v1856_v21  ;;  %v1859_v27 = vpop.f32.mrb[54].mxu0  ;;  %v1098_v2 = vsel %vm1066_vm9, %v1028_v18, %v1082_v20 }
 0x160   :  { %v1860_v28 = vpop.f32.mrb[55].mxu0 }
 0x161   :  { %v939_v30 = vadd.f32 %v1858_v25, %v2719_v8  ;;  %v1861_v54 = vadd.f32 %v1860_v28, %v1859_v27  ;;  %v1099_v31 = vsel %vm1067_vm10, %v1031_v52, %v1083_v24 }
 0x162   :  { %v1110_v33 = vpack.c.bf16 %v1099_v31, %v1098_v2 }
 0x163   :  { %v1036_v35 = vadd.f32 %v2739_v32, %v939_v30  ;;  %v942_v57 = vadd.f32 %v1861_v54, %v2721_v11 }
 0x164   :  { %1962 = vmatprep.mubr.bf16.mxu1 %v1110_v33 }
 0x165   :  { %v1084_v37 = vmul.f32 0.01, %v1036_v35  ;;  %v1039_v38 = vadd.f32 %v2742_v41, %v942_v57  ;;  %v1862_v6 = vpop.f32.mrb[56].mxu0  ;;  %vm1068_vm11 = vcmp.gt.f32.partialorder %v1036_v35, 0.0 }
 0x166   :  { %v1863_v40 = vpop.f32.mrb[57].mxu0 }
 0x167   :  { %v1085_v42 = vmul.f32 0.01, %v1039_v38  ;;  %v1864_v43 = vadd.f32 %v1863_v40, %v1862_v6  ;;  %v1865_v44 = vpop.f32.mrb[58].mxu0  ;;  %vm1069_vm12 = vcmp.gt.f32.partialorder %v1039_v38, 0.0  ;;  %v1100_v50 = vsel %vm1068_vm11, %v1036_v35, %v1084_v37 }
 0x168   :  { %v1866_v8 = vpop.f32.mrb[59].mxu0 }
 0x169   :  { %v1867_v46 = vadd.f32 %v1866_v8, %v1865_v44  ;;  %v947_v48 = vadd.f32 %v1864_v43, %v2725_v26  ;;  %v1101_v51 = vsel %vm1069_vm12, %v1039_v38, %v1085_v42 }
 0x16a   :  { %v1111_v32 = vpack.c.bf16 %v1101_v51, %v1100_v50 }
 0x16b   :  { %v1044_v53 = vadd.f32 %v1043_v22, %v947_v48  ;;  %v950_v11 = vadd.f32 %v1867_v46, %v2727_v29 }
 0x16c   :  { %1963 = vmatmul.mubr.bf16.gmra.mrb[56].mxu1 %v1111_v32 }
 0x16d   :  { %v1086_v55 = vmul.f32 0.01, %v1044_v53  ;;  %v1047_v41 = vadd.f32 %v1046_v3, %v950_v11  ;;  %v1868_v56 = vpop.f32.mrb[60].mxu0  ;;  %vm1070_vm13 = vcmp.gt.f32.partialorder %v1044_v53, 0.0 }
 0x16e   :  { %v1869_v58 = vpop.f32.mrb[61].mxu0 }
 0x16f   :  { %vm1071_vm14 = vcmp.gt.f32.partialorder %v1047_v41, 0.0  ;;  %v1087_v59 = vmul.f32 0.01, %v1047_v41  ;;  %v1870_v60 = vadd.f32 %v1869_v58, %v1868_v56  ;;  %v1871_v61 = vpop.f32.mrb[62].mxu0  ;;  %v1102_v0 = vsel %vm1070_vm13, %v1044_v53, %v1086_v55 }
 0x170   :  { %v1872_v62 = vpop.f32.mrb[63].mxu0 }
 0x171   :  { %v955_v34 = vadd.f32 %v1870_v60, %v2731_v45  ;;  %v1873_v26 = vadd.f32 %v1872_v62, %v1871_v61  ;;  %v1103_v1 = vsel %vm1071_vm14, %v1047_v41, %v1087_v59  ;;  %v2766_v45 = vld [vmem:[%s2853_s4] ss:$0 sm:$0xff] }
 0x172   :  { %v1112_v4 = vpack.c.bf16 %v1103_v1, %v1102_v0 }
 0x173   :  { %v1052_v22 = vadd.f32 %v2745_v19, %v955_v34  ;;  %v958_v29 = vadd.f32 %v1873_v26, %v2733_v49 }
 0x174   :  { %1966 = vmatprep.mubr.bf16.mxu1 %v1112_v4 }
 0x175   :  { %v1088_v3 = vmul.f32 0.01, %v1052_v22  ;;  %v1055_v5 = vadd.f32 %v2748_v63, %v958_v29  ;;  %vm1072_vm15 = vcmp.gt.f32.partialorder %v1052_v22, 0.0 }
 0x177   :  { %v1089_v7 = vmul.f32 0.01, %v1055_v5  ;;  %vm1073_vm0 = vcmp.gt.f32.partialorder %v1055_v5, 0.0  ;;  %v1104_v9 = vsel %vm1072_vm15, %v1052_v22, %v1088_v3 }
 0x179   :  { %v1105_v10 = vsel %vm1073_vm0, %v1055_v5, %v1089_v7 }
 0x17a   :  { %v1113_v13 = vpack.c.bf16 %v1105_v10, %v1104_v9 }
 0x17c   :  { %1967 = vmatmul.mubr.bf16.gmra.mrb[60].mxu1 %v1113_v13 }
 0x21f   :  { %v1956_v36 = vpop.f32.mrb[48].mxu1 }
 0x220   :  { %v1205_v19 = vadd.f32 %v1956_v36, %v2766_v45  ;;  %v1196_v49 = vpop.f32.mrb[49].mxu1 }
 0x221   :  { %v1197_v47 = vadd.f32 %v2766_v45, %v1196_v49  ;;  %v1957_v14 = vpop.f32.mrb[50].mxu1 }
 0x222   :  { %v1277_v63 = vmul.f32 0.01, %v1205_v19  ;;  %v1208_v15 = vadd.f32 %v1957_v14, %v2766_v45  ;;  %v1199_v16 = vpop.f32.mrb[51].mxu1  ;;  %vm1261_vm1 = vcmp.gt.f32.partialorder %v1205_v19, 0.0 }
 0x223   :  { %v1275_v17 = vmul.f32 0.01, %v1197_v47  ;;  %v1200_v12 = vadd.f32 %v2766_v45, %v1199_v16  ;;  %vm1259_vm2 = vcmp.gt.f32.partialorder %v1197_v47, 0.0 }
 0x224   :  { %vm1262_vm3 = vcmp.gt.f32.partialorder %v1208_v15, 0.0  ;;  %v1278_v18 = vmul.f32 0.01, %v1208_v15  ;;  %v1293_v20 = vsel %vm1261_vm1, %v1205_v19, %v1277_v63 }
 0x225   :  { %vm1260_vm4 = vcmp.gt.f32.partialorder %v1200_v12, 0.0  ;;  %v1276_v39 = vmul.f32 0.01, %v1200_v12  ;;  %v1291_v21 = vsel %vm1259_vm2, %v1197_v47, %v1275_v17  ;;  %vm2103_vm2 = vmmov 0  }
 0x226   :  { %v1294_v52 = vsel %vm1262_vm3, %v1208_v15, %v1278_v18 }
 0x227   :  { %v1308_v23 = vpack.c.bf16 %v1294_v52, %v1293_v20  ;;  %v1292_v24 = vsel %vm1260_vm4, %v1200_v12, %v1276_v39  ;;  %v2102_v12 = vmov 0.0  }
 0x228   :  { %v1307_v25 = vpack.c.bf16 %v1292_v24, %v1291_v21  ;;  %1994 = vmatprep.subr.bf16.mxu1 %v2102_v12  ;;  %2010 = vmatprep.mubr.msk.bf16.mxu1 %vm2103_vm2, %v2102_v12 }
 0x22a   :  { %1978 = vmatprep.mubr.msk.bf16.mxu0 %vm1339_vm5, %v1307_v25 }
 0x22b   :  { %1979 = vmatmul.mubr.msk.bf16.vlgmr.msra.gmra.mrb[64].mxu0 %vm1339_vm5, %v1308_v23 }
 0x22f   :  { %v1960_v27 = vpop.f32.mrb[52].mxu1 }
 0x230   :  { %v1221_v28 = vadd.f32 %v1960_v27, %v2766_v45  ;;  %v1212_v30 = vpop.f32.mrb[53].mxu1 }
 0x231   :  { %v1213_v54 = vadd.f32 %v2766_v45, %v1212_v30  ;;  %v1961_v2 = vpop.f32.mrb[54].mxu1 }
 0x232   :  { %v1281_v31 = vmul.f32 0.01, %v1221_v28  ;;  %v1224_v33 = vadd.f32 %v1961_v2, %v2766_v45  ;;  %v1215_v35 = vpop.f32.mrb[55].mxu1  ;;  %vm1265_vm6 = vcmp.gt.f32.partialorder %v1221_v28, 0.0 }
 0x233   :  { %v1279_v57 = vmul.f32 0.01, %v1213_v54  ;;  %v1216_v37 = vadd.f32 %v2766_v45, %v1215_v35  ;;  %vm1263_vm7 = vcmp.gt.f32.partialorder %v1213_v54, 0.0 }
 0x234   :  { %vm1266_vm8 = vcmp.gt.f32.partialorder %v1224_v33, 0.0  ;;  %v1282_v38 = vmul.f32 0.01, %v1224_v33  ;;  %v1297_v40 = vsel %vm1265_vm6, %v1221_v28, %v1281_v31 }
 0x235   :  { %vm1264_vm9 = vcmp.gt.f32.partialorder %v1216_v37, 0.0  ;;  %v1280_v6 = vmul.f32 0.01, %v1216_v37  ;;  %v1295_v43 = vsel %vm1263_vm7, %v1213_v54, %v1279_v57  ;;  %vm1518_vm7 = vcmask 261120  }
 0x236   :  { %v1298_v42 = vsel %vm1266_vm8, %v1224_v33, %v1282_v38 }
 0x237   :  { %v1310_v44 = vpack.c.bf16 %v1298_v42, %v1297_v40  ;;  %v1296_v8 = vsel %vm1264_vm9, %v1216_v37, %v1280_v6 }
 0x238   :  { %v1309_v46 = vpack.c.bf16 %v1296_v8, %v1295_v43 }
 0x23a   :  { %1982 = vmatprep.mubr.msk.bf16.mxu0 %vm1339_vm5, %v1309_v46 }
 0x23b   :  { %1983 = vmatmul.mubr.msk.bf16.gmra.mrb[68].mxu0 %vm1339_vm5, %v1310_v44 }
 0x23f   :  { %v1964_v48 = vpop.f32.mrb[56].mxu1 }
 0x240   :  { %v1237_v50 = vadd.f32 %v1964_v48, %v2766_v45  ;;  %v1228_v51 = vpop.f32.mrb[57].mxu1 }
 0x241   :  { %v1229_v32 = vadd.f32 %v2766_v45, %v1228_v51  ;;  %v1965_v53 = vpop.f32.mrb[58].mxu1 }
 0x242   :  { %v1285_v11 = vmul.f32 0.01, %v1237_v50  ;;  %v1240_v55 = vadd.f32 %v1965_v53, %v2766_v45  ;;  %v1231_v41 = vpop.f32.mrb[59].mxu1  ;;  %vm1269_vm10 = vcmp.gt.f32.partialorder %v1237_v50, 0.0 }
 0x243   :  { %v1283_v56 = vmul.f32 0.01, %v1229_v32  ;;  %v1232_v58 = vadd.f32 %v2766_v45, %v1231_v41  ;;  %vm1267_vm11 = vcmp.gt.f32.partialorder %v1229_v32, 0.0 }
 0x244   :  { %vm1270_vm12 = vcmp.gt.f32.partialorder %v1240_v55, 0.0  ;;  %v1286_v59 = vmul.f32 0.01, %v1240_v55  ;;  %v1301_v61 = vsel %vm1269_vm10, %v1237_v50, %v1285_v11 }
 0x245   :  { %vm1268_vm13 = vcmp.gt.f32.partialorder %v1232_v58, 0.0  ;;  %v1284_v60 = vmul.f32 0.01, %v1232_v58  ;;  %v1299_v34 = vsel %vm1267_vm11, %v1229_v32, %v1283_v56 }
 0x246   :  { %v1302_v62 = vsel %vm1270_vm12, %v1240_v55, %v1286_v59 }
 0x247   :  { %v1312_v26 = vpack.c.bf16 %v1302_v62, %v1301_v61  ;;  %v1300_v0 = vsel %vm1268_vm13, %v1232_v58, %v1284_v60 }
 0x248   :  { %v1311_v1 = vpack.c.bf16 %v1300_v0, %v1299_v34 }
 0x24a   :  { %1986 = vmatprep.mubr.msk.bf16.mxu0 %vm1339_vm5, %v1311_v1 }
 0x24b   :  { %1987 = vmatmul.mubr.msk.bf16.gmra.mrb[72].mxu0 %vm1339_vm5, %v1312_v26 }
 0x24f   :  { %v1968_v4 = vpop.f32.mrb[60].mxu1 }
 0x250   :  { %v1253_v22 = vadd.f32 %v1968_v4, %v2766_v45  ;;  %v1244_v29 = vpop.f32.mrb[61].mxu1 }
 0x251   :  { %v1245_v3 = vadd.f32 %v2766_v45, %v1244_v29  ;;  %v1969_v5 = vpop.f32.mrb[62].mxu1 }
 0x252   :  { %v1289_v7 = vmul.f32 0.01, %v1253_v22  ;;  %v1256_v9 = vadd.f32 %v1969_v5, %v2766_v45  ;;  %v1247_v10 = vpop.f32.mrb[63].mxu1  ;;  %vm1273_vm14 = vcmp.gt.f32.partialorder %v1253_v22, 0.0 }
 0x253   :  { %v1287_v13 = vmul.f32 0.01, %v1245_v3  ;;  %v1248_v36 = vadd.f32 %v2766_v45, %v1247_v10  ;;  %vm1271_vm15 = vcmp.gt.f32.partialorder %v1245_v3, 0.0  ;;  %v2797_v45 = vld [vmem:[%s2855_s6] ss:$0 sm:$0xff] }
 0x254   :  { %vm1274_vm0 = vcmp.gt.f32.partialorder %v1256_v9, 0.0  ;;  %v1290_v19 = vmul.f32 0.01, %v1256_v9  ;;  %v1305_v47 = vsel %vm1273_vm14, %v1253_v22, %v1289_v7 }
 0x255   :  { %vm1272_vm1 = vcmp.gt.f32.partialorder %v1248_v36, 0.0  ;;  %v1288_v49 = vmul.f32 0.01, %v1248_v36  ;;  %v1303_v63 = vsel %vm1271_vm15, %v1245_v3, %v1287_v13 }
 0x256   :  { %v1306_v14 = vsel %vm1274_vm0, %v1256_v9, %v1290_v19 }
 0x257   :  { %v1314_v15 = vpack.c.bf16 %v1306_v14, %v1305_v47  ;;  %v1304_v16 = vsel %vm1272_vm1, %v1248_v36, %v1288_v49 }
 0x258   :  { %v1313_v17 = vpack.c.bf16 %v1304_v16, %v1303_v63 }
 0x25a   :  { %1990 = vmatprep.mubr.msk.bf16.mxu0 %vm1339_vm5, %v1313_v17 }
 0x25b   :  { %1991 = vmatmul.mubr.msk.bf16.gmra.mrb[76].mxu0 %vm1339_vm5, %v1314_v15 }
 0x2fe   :  { %v1980_v18 = vpop.f32.mrb[64].mxu0 }
 0x2ff   :  { %v1407_v39 = vadd.f32 %v1980_v18, %v2797_v45  ;;  %v1398_v20 = vpop.f32.mrb[65].mxu0 }
 0x300   :  { %v1399_v52 = vadd.f32 %v2797_v45, %v1398_v20  ;;  %v1981_v21 = vpop.f32.mrb[66].mxu0 }
 0x301   :  { %v1479_v23 = vmul.f32 0.01, %v1407_v39  ;;  %v1410_v24 = vadd.f32 %v1981_v21, %v2797_v45  ;;  %v1401_v25 = vpop.f32.mrb[67].mxu0  ;;  %vm1463_vm3 = vcmp.gt.f32.partialorder %v1407_v39, 0.0 }
 0x302   :  { %v1477_v27 = vmul.f32 0.01, %v1399_v52  ;;  %v1402_v28 = vadd.f32 %v2797_v45, %v1401_v25  ;;  %vm1461_vm4 = vcmp.gt.f32.partialorder %v1399_v52, 0.0 }
 0x303   :  { %vm1464_vm5 = vcmp.gt.f32.partialorder %v1410_v24, 0.0  ;;  %v1480_v30 = vmul.f32 0.01, %v1410_v24  ;;  %v1495_v2 = vsel %vm1463_vm3, %v1407_v39, %v1479_v23 }
 0x304   :  { %vm1462_vm6 = vcmp.gt.f32.partialorder %v1402_v28, 0.0  ;;  %v1478_v54 = vmul.f32 0.01, %v1402_v28  ;;  %v1493_v33 = vsel %vm1461_vm4, %v1399_v52, %v1477_v27 }
 0x305   :  { %v1496_v31 = vsel %vm1464_vm5, %v1410_v24, %v1480_v30 }
 0x306   :  { %v1494_v35 = vsel %vm1462_vm6, %v1402_v28, %v1478_v54  ;;  %v1510_v57 = vpack.c.bf16 %v1496_v31, %v1495_v2 }
 0x307   :  { %v1509_v37 = vpack.c.bf16 %v1494_v35, %v1493_v33 }
 0x308   :  { %v1526_v50 = vsel %vm1518_vm7, %v1510_v57, 0 }
 0x309   :  { %v1523_v38 = vsel %vm1518_vm7, %v1509_v37, 0  ;;  %v157_v37 = vld [vmem:[%s2856_s7] sm:$0x1] }
 0x30a   :  { %1995 = vmatpush3.bf16.xpose.msra.mxu1 %v1523_v38  ;;  %v1517_v38 = vstv %s2857_s8 }
 0x30b   :  { %1996 = vmatprep.subr.bf16.mxu1 %v2102_v12 }
 0x30e   :  { %v1984_v6 = vpop.f32.mrb[68].mxu0 }
 0x30f   :  { %v1423_v40 = vadd.f32 %v1984_v6, %v2797_v45  ;;  %v1414_v42 = vpop.f32.mrb[69].mxu0 }
 0x310   :  { %v1415_v43 = vadd.f32 %v2797_v45, %v1414_v42  ;;  %v1985_v44 = vpop.f32.mrb[70].mxu0 }
 0x311   :  { %v1483_v8 = vmul.f32 0.01, %v1423_v40  ;;  %v1426_v46 = vadd.f32 %v1985_v44, %v2797_v45  ;;  %v1417_v48 = vpop.f32.mrb[71].mxu0  ;;  %vm1467_vm8 = vcmp.gt.f32.partialorder %v1423_v40, 0.0 }
 0x312   :  { %v1481_v51 = vmul.f32 0.01, %v1415_v43  ;;  %v1418_v32 = vadd.f32 %v2797_v45, %v1417_v48  ;;  %1997 = vmatpush3.bf16.xpose.msra.mxu1 %v1526_v50  ;;  %vm1465_vm9 = vcmp.gt.f32.partialorder %v1415_v43, 0.0 }
 0x313   :  { %vm1468_vm10 = vcmp.gt.f32.partialorder %v1426_v46, 0.0  ;;  %v1484_v53 = vmul.f32 0.01, %v1426_v46  ;;  %1998 = vmatprep.subr.bf16.mxu1 %v2102_v12  ;;  %v1499_v55 = vsel %vm1467_vm8, %v1423_v40, %v1483_v8 }
 0x314   :  { %vm1466_vm11 = vcmp.gt.f32.partialorder %v1418_v32, 0.0  ;;  %v1482_v11 = vmul.f32 0.01, %v1418_v32  ;;  %v1497_v56 = vsel %vm1465_vm9, %v1415_v43, %v1481_v51 }
 0x315   :  { %v1500_v41 = vsel %vm1468_vm10, %v1426_v46, %v1484_v53 }
 0x316   :  { %v1498_v58 = vsel %vm1466_vm11, %v1418_v32, %v1482_v11  ;;  %v1512_v59 = vpack.c.bf16 %v1500_v41, %v1499_v55 }
 0x317   :  { %v1511_v60 = vpack.c.bf16 %v1498_v58, %v1497_v56 }
 0x318   :  { %v1532_v3 = vsel %vm1518_vm7, %v1512_v59, 0 }
 0x319   :  { %v1529_v61 = vsel %vm1518_vm7, %v1511_v60, 0 }
 0x31a   :  { %1999 = vmatpush3.bf16.xpose.msra.mxu1 %v1529_v61 }
 0x31b   :  { %2000 = vmatprep.subr.bf16.mxu1 %v2102_v12 }
 0x31e   :  { %v1988_v62 = vpop.f32.mrb[72].mxu0 }
 0x31f   :  { %v1439_v34 = vadd.f32 %v1988_v62, %v2797_v45  ;;  %v1430_v26 = vpop.f32.mrb[73].mxu0 }
 0x320   :  { %v1431_v0 = vadd.f32 %v2797_v45, %v1430_v26  ;;  %v1989_v1 = vpop.f32.mrb[74].mxu0 }
 0x321   :  { %v1487_v4 = vmul.f32 0.01, %v1439_v34  ;;  %v1442_v22 = vadd.f32 %v1989_v1, %v2797_v45  ;;  %v1433_v29 = vpop.f32.mrb[75].mxu0  ;;  %vm1471_vm12 = vcmp.gt.f32.partialorder %v1439_v34, 0.0 }
 0x322   :  { %v1485_v5 = vmul.f32 0.01, %v1431_v0  ;;  %v1434_v7 = vadd.f32 %v2797_v45, %v1433_v29  ;;  %2001 = vmatpush3.bf16.xpose.msra.mxu1 %v1532_v3  ;;  %vm1469_vm13 = vcmp.gt.f32.partialorder %v1431_v0, 0.0 }
 0x323   :  { %vm1472_vm14 = vcmp.gt.f32.partialorder %v1442_v22, 0.0  ;;  %v1488_v9 = vmul.f32 0.01, %v1442_v22  ;;  %2002 = vmatprep.subr.bf16.mxu1 %v2102_v12  ;;  %v1503_v13 = vsel %vm1471_vm12, %v1439_v34, %v1487_v4 }
 0x324   :  { %vm1470_vm15 = vcmp.gt.f32.partialorder %v1434_v7, 0.0  ;;  %v1486_v10 = vmul.f32 0.01, %v1434_v7  ;;  %v1501_v19 = vsel %vm1469_vm13, %v1431_v0, %v1485_v5 }
 0x325   :  { %v1504_v36 = vsel %vm1472_vm14, %v1442_v22, %v1488_v9 }
 0x326   :  { %v1502_v49 = vsel %vm1470_vm15, %v1434_v7, %v1486_v10  ;;  %v1514_v47 = vpack.c.bf16 %v1504_v36, %v1503_v13 }
 0x327   :  { %v1513_v14 = vpack.c.bf16 %v1502_v49, %v1501_v19 }
 0x328   :  { %v1538_v23 = vsel %vm1518_vm7, %v1514_v47, 0 }
 0x329   :  { %v1535_v63 = vsel %vm1518_vm7, %v1513_v14, 0 }
 0x32a   :  { %2003 = vmatpush3.bf16.xpose.msra.mxu1 %v1535_v63 }
 0x32b   :  { %2004 = vmatprep.subr.bf16.mxu1 %v2102_v12 }
 0x32e   :  { %v1992_v15 = vpop.f32.mrb[76].mxu0 }
 0x32f   :  { %v1455_v16 = vadd.f32 %v1992_v15, %v2797_v45  ;;  %v1446_v17 = vpop.f32.mrb[77].mxu0 }
 0x330   :  { %v1447_v18 = vadd.f32 %v2797_v45, %v1446_v17  ;;  %v1993_v39 = vpop.f32.mrb[78].mxu0 }
 0x331   :  { %v1491_v20 = vmul.f32 0.01, %v1455_v16  ;;  %v1458_v52 = vadd.f32 %v1993_v39, %v2797_v45  ;;  %v1449_v21 = vpop.f32.mrb[79].mxu0  ;;  %vm1475_vm0 = vcmp.gt.f32.partialorder %v1455_v16, 0.0 }
 0x332   :  { %v1489_v24 = vmul.f32 0.01, %v1447_v18  ;;  %v1450_v25 = vadd.f32 %v2797_v45, %v1449_v21  ;;  %2005 = vmatpush3.bf16.xpose.msra.mxu1 %v1538_v23  ;;  %vm1473_vm1 = vcmp.gt.f32.partialorder %v1447_v18, 0.0 }
 0x333   :  { %vm1476_vm2 = vcmp.gt.f32.partialorder %v1458_v52, 0.0  ;;  %v1492_v27 = vmul.f32 0.01, %v1458_v52  ;;  %2006 = vmatprep.subr.bf16.mxu1 %v2102_v12  ;;  %v1507_v30 = vsel %vm1475_vm0, %v1455_v16, %v1491_v20 }
 0x334   :  { %vm1474_vm3 = vcmp.gt.f32.partialorder %v1450_v25, 0.0  ;;  %v1490_v28 = vmul.f32 0.01, %v1450_v25  ;;  %v1505_v2 = vsel %vm1473_vm1, %v1447_v18, %v1489_v24 }
 0x335   :  { %v1508_v54 = vsel %vm1476_vm2, %v1458_v52, %v1492_v27 }
 0x336   :  { %v1506_v31 = vsel %vm1474_vm3, %v1450_v25, %v1490_v28  ;;  %v1516_v33 = vpack.c.bf16 %v1508_v54, %v1507_v30 }
 0x337   :  { %v1515_v35 = vpack.c.bf16 %v1506_v31, %v1505_v2 }
 0x338   :  { %v1544_v45 = vsel %vm1518_vm7, %v1516_v33, 0 }
 0x339   :  { %v1541_v57 = vsel %vm1518_vm7, %v1515_v35, 0 }
 0x33a   :  { %2007 = vmatpush3.bf16.xpose.msra.mxu1 %v1541_v57 }
 0x33b   :  { %2008 = vmatprep.subr.bf16.mxu1 %v2102_v12 }
 0x342   :  { %2009 = vmatpush3.bf16.xpose.msra.mxu1 %v1544_v45 }
 0x349   :  { %2011 = vmatmul.mubr.msk.bf16.vlgmr.msra.gmra.mrb[64].mxu1 %vm1518_vm7, %v157_v37 }
 0x41c   :  { %v1580_v6 = vpop.f32.mrb[64].mxu1 }
 0x41d   :  { %v1581_v40 = vadd.f32 %v1580_v6, %v1517_v38  ;;  %v2012_v42 = vpop.f32.mrb[65].mxu1 }
 0x41e   :  { %v1583_v12 = vpop.f32.mrb[66].mxu1 }
 0x41f   :  { %1586 = vst [vmem:[#allocation3] sm:$0x1] %v1581_v40  ;;  %v2013_v43 = vpop.f32.mrb[67].mxu1 }
 0x420   :  { %2089 = shalt.err (!%p2086_p4)
}
 0x421   :  { %s2090_s8 = scalar_lea.hbm %s2858_s9, 16 }
 0x422   :  { %p2091_p5 = scmp.ne.s32.totalorder %s2858_s9, %s2090_s8  ;;  %p2094_p6 = scmp.lt.u32.totalorder %s2090_s8, %s2858_s9 }
 0x424   :  { %p2096_p7 = pnand %p2094_p6, %p2091_p5 }
 0x426   :  { %2099 = shalt.err (!%p2096_p7)
}
 0x427   :  { %1596 = dma.vmem_to_hbm [thread:$0]  %s1594_s16, 16, %s2858_s9, [#allocation4]  }
 0x428   :  { %2100 = dma.done.wait [#allocation4], 16  }
 0x429   :  { %2101 = vsyncadd [#allocation4], 4294967280 }
 0x42a   :  { %1600 = vsyncpa [#allocation4], 1 }

</bundles_post_ra>
